<compile_context>
chip_gen: v7x
topology: tpu7x:2x2x1
jax: 0.10.0
libtpu: 0.0.40
codegen_flags: <defaults>
</compile_context>

<pallas_src>
import jax
import jax.numpy as jnp
from jax.experimental import pallas as pl
from jax.experimental.pallas import tpu as pltpu

# ---------------- synthetic config (small, consistent with the module) -------
H = 32               # hidden_channels
K = 5                # cfg.model.decoder.conv.conv_kernel_size
PAD = (K - 1) // 2
N_LAYERS = 2         # cfg.model.decoder.conv.n_conv_layers
N_CONVS = 2 * N_LAYERS
N_MELS = 8           # cfg.data.audio.n_mels
UPS = 2              # get_upsample(cfg)
UPS_HUB = 2          # get_upsample_hubert(cfg)
N_CLUSTERS = 4       # cfg.model.decoder.hubert.n_clusters
ENC_DIM = 16         # cfg.model.decoder.hubert.encoder_output_dim
BN_EPS = 1e-5

B, T = 2, 16         # batch, sequence length
BT = B * T

# Head layout (order: mel, hubert_encoder, hubert_cluster, hubert_prj).
# u-major column packing requires a shared upsample factor across heads.
assert UPS == UPS_HUB, "u-major head packing assumes a shared upsample factor"
# TODO(synk): if get_upsample(cfg) != get_upsample_hubert(cfg), fall back to
# head-major column packing + a per-head reshape in the wrapper.
HEAD_BASES = (N_MELS, H, N_CLUSTERS + 1, ENC_DIM)          # (8, 32, 5, 16)
HEAD_OFFSETS = []
_off = 0
for _b in HEAD_BASES:
    HEAD_OFFSETS.append(_off)
    _off += _b
PER_U = sum(HEAD_BASES)                                    # 61
PER_U_PADDED = ((PER_U + 7) // 8) * 8                      # 64
HEAD_PADDED = UPS_HUB * PER_U_PADDED                       # 128 -> lane-dense output slab


# ---------------- fused Pallas kernel -----------------------------------------
def _fused_decoder_kernel(x_ref, wc_ref, sh_ref, wh_ref, bh_ref, out_ref):
    """Whole batch in one shot: N_LAYERS ResBlocks (4 convs) + fused 4-way head.

    x_ref  : (B*T, H)              input activations, channels-last (lane dim = H)
    wc_ref : (N_CONVS, K, H, H)    per-tap conv weights, BN scale folded in
    sh_ref : (N_CONVS, 1, H)       folded BN shift (+ conv bias * scale)
    wh_ref : (H, HEAD_PADDED)      fused 1x1 head weights, u-major column layout
    bh_ref : (1, HEAD_PADDED)      fused head biases
    out_ref: (B*T, HEAD_PADDED)    lane-dense fused head output
    """
    h = x_ref[...].astype(jnp.float32)                      # (BT, H) stays in vregs/VMEM
    bt = h.shape[0]

    # Per-tap row-validity masks.  Row r = b*T + t; tap k (after the roll below)
    # reads source row r + k - PAD.  The mask zeroes taps whose source row falls
    # outside the SAME batch element, which covers both the conv 'same' padding
    # and the batch boundary (the batch is folded into this single invocation).
    row = jax.lax.broadcasted_iota(jnp.int32, (bt, 1), 0)
    lt = row % T                                            # local time index
    tap_masks = [
        ((lt >= PAD - k) & (lt < T + PAD - k)).astype(jnp.float32)
        for k in range(K)
    ]

    # TODO(synk): for larger B/T, pack 4 row-groups along lanes with a
    # block-diagonal (128,128) conv weight to make the VPU/store path lane-dense.
    for layer in range(N_LAYERS):                           # static -> fully unrolled
        res = h
        for conv in range(2):
            idx = 2 * layer + conv
            acc = None
            for k in range(K):
                if k == PAD:
                    tap = h                                 # center tap: no shift/mask
                else:
                    # sublane roll (XLU) + row mask (VPU): no unaligned slices,
                    # no concat-built im2col slab.
                    tap = pltpu.roll(h, (PAD - k) % BT, axis=0) * tap_masks[k]
                p = jnp.dot(tap, wc_ref[idx, k],
                            preferred_element_type=jnp.float32)
                acc = p if acc is None else acc + p          # single acc chain (MRB on v7x)
            # BN scale is folded into wc; epilogue = shift + ReLU (Dropout = identity)
            h = jnp.maximum(acc + sh_ref[idx], 0.0)
        h = h + res                                          # ResBlock residual

    # All four 1x1-conv heads as one lane-dense matmul.
    out_ref[...] = (jnp.dot(h, wh_ref[...], preferred_element_type=jnp.float32)
                    + bh_ref[...]).astype(out_ref.dtype)


def _fused_decoder_call(x2d, packed):
    # No grid: a single invocation with everything VMEM-resident (<0.5 MiB),
    # so the constant weights are not pipelined / double-buffered.
    vmem = pl.BlockSpec(memory_space=pltpu.MemorySpace.VMEM)
    return pl.pallas_call(
        _fused_decoder_kernel,
        out_shape=jax.ShapeDtypeStruct((x2d.shape[0], HEAD_PADDED), jnp.float32),
        in_specs=[vmem, vmem, vmem, vmem, vmem],
        out_specs=vmem,
    )(x2d, packed["wc"], packed["sh"], packed["wh"], packed["bh"])


def conv_decoder_hubert(x, packed):
    """x: (B, T, C) -> (mel, hubert_encoder, hubert_cluster, hubert_prj),
    each (B, base_dim, T*upsample) exactly like the PyTorch module."""
    bn, tn, c = x.shape
    y = _fused_decoder_call(x.reshape(bn * tn, c), packed)   # (B*T, HEAD_PADDED)
    # One reshape exposes the upsample factor for ALL heads (u-major packing);
    # this matches torch's (B,T,O) -> (B,T*ups,base) row-major reshape.
    y = y.reshape(bn, tn * UPS_HUB, PER_U_PADDED)
    outs = []
    for off, base in zip(HEAD_OFFSETS, HEAD_BASES):
        outs.append(jnp.transpose(y[:, :, off:off + base], (0, 2, 1)))  # (B, base, T*ups)
    return tuple(outs)


# ---------------- deterministic parameter init --------------------------------
def init_params(key):
    params = {"resblocks": []}
    for _ in range(N_LAYERS):
        lp = {}
        for tag in ("1", "2"):
            key, kw, kb, kg, kbe, km, kv = jax.random.split(key, 7)
            lp["w" + tag] = 0.1 * jax.random.normal(kw, (K, H, H), jnp.float32)   # (k, cin, cout)
            lp["b" + tag] = 0.1 * jax.random.normal(kb, (H,), jnp.float32)
            lp["gamma" + tag] = 1.0 + 0.1 * jax.random.normal(kg, (H,), jnp.float32)
            lp["beta" + tag] = 0.1 * jax.random.normal(kbe, (H,), jnp.float32)
            lp["rmean" + tag] = 0.1 * jax.random.normal(km, (H,), jnp.float32)
            lp["rvar" + tag] = 0.8 + 0.4 * jax.random.uniform(kv, (H,), jnp.float32)
        params["resblocks"].append(lp)

    def head(key, out_ch):
        key, k1, k2 = jax.random.split(key, 3)
        return (key,
                0.1 * jax.random.normal(k1, (H, out_ch), jnp.float32),
                0.1 * jax.random.normal(k2, (out_ch,), jnp.float32))

    key, params["w_mel"], params["b_mel"] = head(key, N_MELS * UPS)
    key, params["w_enc"], params["b_enc"] = head(key, H * UPS_HUB)
    key, params["w_clu"], params["b_clu"] = head(key, (N_CLUSTERS + 1) * UPS_HUB)
    key, params["w_prj"], params["b_prj"] = head(key, ENC_DIM * UPS_HUB)
    return params


# ---------------- one-time weight packing --------------------------------------
def pack_params(params):
    """Fold eval-mode BN (general running-stats formula) into the conv weights,
    stack per-tap weights, and fuse all head weights u-major."""
    wcs, shs = [], []
    for lp in params["resblocks"]:
        for tag in ("1", "2"):
            scale = lp["gamma" + tag] / jnp.sqrt(lp["rvar" + tag] + BN_EPS)
            shift = lp["beta" + tag] + (lp["b" + tag] - lp["rmean" + tag]) * scale
            wcs.append(lp["w" + tag] * scale[None, None, :])        # (K, H, H)
            shs.append(shift.reshape(1, H))
    wc = jnp.stack(wcs)                                             # (N_CONVS, K, H, H)
    sh = jnp.stack(shs)                                             # (N_CONVS, 1, H)

    # u-major head packing.  torch head out-channel index o = u*base + c
    # (that is what the module's (B,T,O)->(B,T*ups,base) reshape implies).
    head_ws = (params["w_mel"], params["w_enc"], params["w_clu"], params["w_prj"])
    head_bs = (params["b_mel"], params["b_enc"], params["b_clu"], params["b_prj"])
    wcols, bcols = [], []
    pad_w = jnp.zeros((H, PER_U_PADDED - PER_U), jnp.float32)
    pad_b = jnp.zeros((PER_U_PADDED - PER_U,), jnp.float32)
    for u in range(UPS_HUB):
        for w, b, base in zip(head_ws, head_bs, HEAD_BASES):
            wcols.append(w[:, u * base:(u + 1) * base])
            bcols.append(b[u * base:(u + 1) * base])
        wcols.append(pad_w)
        bcols.append(pad_b)
    wh = jnp.concatenate(wcols, axis=1)                             # (H, HEAD_PADDED)
    bh = jnp.concatenate(bcols).reshape(1, HEAD_PADDED)             # (1, HEAD_PADDED)
    return {"wc": wc, "sh": sh, "wh": wh, "bh": bh}


# ---------------- pure-JAX reference (true module semantics) -------------------
def ref_forward(x, params):
    h = x
    for lp in params["resblocks"]:
        res = h
        for tag in ("1", "2"):
            xpad = jnp.pad(h, ((0, 0), (PAD, PAD), (0, 0)))
            tn = h.shape[1]
            z = sum(jnp.einsum("btc,cd->btd", xpad[:, k:k + tn], lp["w" + tag][k])
                    for k in range(K)) + lp["b" + tag]
            z = ((z - lp["rmean" + tag]) / jnp.sqrt(lp["rvar" + tag] + BN_EPS)
                 * lp["gamma" + tag] + lp["beta" + tag])
            h = jnp.maximum(z, 0.0)                         # Dropout = identity (eval)
        h = h + res
    bn, tn, _ = x.shape

    def head_out(w, b, base, ups):
        y = jnp.einsum("btc,co->bto", h, w) + b             # (B, T, base*ups)
        y = y.reshape(bn, tn * ups, base)                   # torch permute+reshape
        return jnp.transpose(y, (0, 2, 1))                  # (B, base, T*ups)

    return (head_out(params["w_mel"], params["b_mel"], N_MELS, UPS),
            head_out(params["w_enc"], params["b_enc"], H, UPS_HUB),
            head_out(params["w_clu"], params["b_clu"], N_CLUSTERS + 1, UPS_HUB),
            head_out(params["w_prj"], params["b_prj"], ENC_DIM, UPS_HUB))


# ---------------- main ----------------------------------------------------------
if __name__ == "__main__":
    key = jax.random.PRNGKey(0)
    k_x, k_p = jax.random.split(key)
    x = jax.random.normal(k_x, (B, T, H), jnp.float32)       # (B, T, C) like the module
    params = init_params(k_p)
    packed = jax.block_until_ready(pack_params(params))      # one-time weight prep

    fwd = jax.jit(conv_decoder_hubert)
    outs = jax.block_until_ready(fwd(x, packed))

    refs = ref_forward(x, params)
    for o, r in zip(outs, refs):
        assert o.shape == r.shape, (o.shape, r.shape)
        assert jnp.allclose(o, r, rtol=1e-3, atol=1e-3), float(jnp.abs(o - r).max())

    # Output shapes (same as PyTorch):
    #   mel     : (B, N_MELS,       T*UPS)
    #   encoder : (B, H,            T*UPS_HUB)
    #   cluster : (B, N_CLUSTERS+1, T*UPS_HUB)
    #   prj     : (B, ENC_DIM,      T*UPS_HUB)
    print("KERNEL_OK")
</pallas_src>

<mosaic_0001>
module attributes {stable_mosaic.version = 11 : i64} {
  func.func @_fused_decoder_kernel(%arg0: memref<32x32xf32, #tpu.memory_space<vmem>>, %arg1: memref<4x5x32x32xf32, #tpu.memory_space<vmem>>, %arg2: memref<4x1x32xf32, #tpu.memory_space<vmem>>, %arg3: memref<32x128xf32, #tpu.memory_space<vmem>>, %arg4: memref<1x128xf32, #tpu.memory_space<vmem>>, %arg5: memref<32x128xf32, #tpu.memory_space<vmem>>) attributes {dimension_semantics = [], scalar_prefetch = 0 : i64, scratch_operands = 0 : i64, tpu.core_type = #tpu.core_type<tc>} {
    %c0 = arith.constant 0 : index
    %c0_0 = arith.constant 0 : index
    %0 = vector.load %arg0[%c0, %c0_0] : memref<32x32xf32, #tpu.memory_space<vmem>>, vector<32x32xf32>
    %1 = tpu.iota {dimensions = array<i32: 0>} : vector<32x1xi32>
    %c16_i32 = arith.constant 16 : i32
    %c0_i32 = arith.constant 0 : i32
    %2 = arith.cmpi eq, %c16_i32, %c0_i32 : i32
    %c1_i32 = arith.constant 1 : i32
    %3 = arith.select %2, %c1_i32, %c16_i32 : i32
    %4 = vector.broadcast %3 : i32 to vector<32x1xi32>
    %5 = arith.remsi %1, %4 : vector<32x1xi32>
    %c0_i32_1 = arith.constant 0 : i32
    %6 = vector.broadcast %c0_i32_1 : i32 to vector<32x1xi32>
    %7 = arith.cmpi ne, %5, %6 : vector<32x1xi32>
    %c0_i32_2 = arith.constant 0 : i32
    %8 = vector.broadcast %c0_i32_2 : i32 to vector<32x1xi32>
    %9 = arith.cmpi slt, %5, %8 : vector<32x1xi32>
    %c0_i32_3 = arith.constant 0 : i32
    %10 = arith.cmpi slt, %3, %c0_i32_3 : i32
    %11 = vector.broadcast %10 : i1 to vector<32x1xi1>
    %12 = vector.broadcast %11 : vector<32x1xi1> to vector<32x1xi1>
    %13 = arith.xori %9, %12 : vector<32x1xi1>
    %14 = arith.andi %13, %7 : vector<32x1xi1>
    %15 = vector.broadcast %3 : i32 to vector<32x1xi32>
    %16 = arith.addi %5, %15 : vector<32x1xi32>
    %17 = arith.select %14, %16, %5 : vector<32x1xi1>, vector<32x1xi32>
    %c2_i32 = arith.constant 2 : i32
    %18 = vector.broadcast %c2_i32 : i32 to vector<32x1xi32>
    %19 = arith.cmpi sge, %17, %18 : vector<32x1xi32>
    %c18_i32 = arith.constant 18 : i32
    %20 = vector.broadcast %c18_i32 : i32 to vector<32x1xi32>
    %21 = arith.cmpi slt, %17, %20 : vector<32x1xi32>
    %22 = arith.andi %19, %21 : vector<32x1xi1>
    %23 = arith.extui %22 : vector<32x1xi1> to vector<32x1xi32>
    %24 = arith.sitofp %23 : vector<32x1xi32> to vector<32x1xf32>
    %c1_i32_4 = arith.constant 1 : i32
    %25 = vector.broadcast %c1_i32_4 : i32 to vector<32x1xi32>
    %26 = arith.cmpi sge, %17, %25 : vector<32x1xi32>
    %c17_i32 = arith.constant 17 : i32
    %27 = vector.broadcast %c17_i32 : i32 to vector<32x1xi32>
    %28 = arith.cmpi slt, %17, %27 : vector<32x1xi32>
    %29 = arith.andi %26, %28 : vector<32x1xi1>
    %30 = arith.extui %29 : vector<32x1xi1> to vector<32x1xi32>
    %31 = arith.sitofp %30 : vector<32x1xi32> to vector<32x1xf32>
    %c-1_i32 = arith.constant -1 : i32
    %32 = vector.broadcast %c-1_i32 : i32 to vector<32x1xi32>
    %33 = arith.cmpi sge, %17, %32 : vector<32x1xi32>
    %c15_i32 = arith.constant 15 : i32
    %34 = vector.broadcast %c15_i32 : i32 to vector<32x1xi32>
    %35 = arith.cmpi slt, %17, %34 : vector<32x1xi32>
    %36 = arith.andi %33, %35 : vector<32x1xi1>
    %37 = arith.extui %36 : vector<32x1xi1> to vector<32x1xi32>
    %38 = arith.sitofp %37 : vector<32x1xi32> to vector<32x1xf32>
    %c-2_i32 = arith.constant -2 : i32
    %39 = vector.broadcast %c-2_i32 : i32 to vector<32x1xi32>
    %40 = arith.cmpi sge, %17, %39 : vector<32x1xi32>
    %c14_i32 = arith.constant 14 : i32
    %41 = vector.broadcast %c14_i32 : i32 to vector<32x1xi32>
    %42 = arith.cmpi slt, %17, %41 : vector<32x1xi32>
    %43 = arith.andi %40, %42 : vector<32x1xi1>
    %44 = arith.extui %43 : vector<32x1xi1> to vector<32x1xi32>
    %45 = arith.sitofp %44 : vector<32x1xi32> to vector<32x1xf32>
    %c2_i32_5 = arith.constant 2 : i32
    %46 = tpu.dynamic_rotate %0 by %c2_i32_5 dim 0 : vector<32x32xf32>, i32 -> vector<32x32xf32>
    %47 = vector.broadcast %24 : vector<32x1xf32> to vector<32x32xf32>
    %48 = arith.mulf %46, %47 : vector<32x32xf32>
    %c0_6 = arith.constant 0 : index
    %c0_7 = arith.constant 0 : index
    %c0_8 = arith.constant 0 : index
    %c0_9 = arith.constant 0 : index
    %49 = vector.load %arg1[%c0_6, %c0_7, %c0_8, %c0_9] : memref<4x5x32x32xf32, #tpu.memory_space<vmem>>, vector<1x1x32x32xf32>
    %50 = vector.shape_cast %49 : vector<1x1x32x32xf32> to vector<32x32xf32>
    %cst = arith.constant dense<0.000000e+00> : vector<32x32xf32>
    %51 = tpu.matmul %48, %50, %cst {dimension_numbers = #tpu.dot_dimension_numbers<[1], [0], [0], [1], [0, 0, 1, 1], [], []>} : vector<32x32xf32>, vector<32x32xf32>, vector<32x32xf32> -> vector<32x32xf32>
    %c1_i32_10 = arith.constant 1 : i32
    %52 = tpu.dynamic_rotate %0 by %c1_i32_10 dim 0 : vector<32x32xf32>, i32 -> vector<32x32xf32>
    %53 = vector.broadcast %31 : vector<32x1xf32> to vector<32x32xf32>
    %54 = arith.mulf %52, %53 : vector<32x32xf32>
    %c0_11 = arith.constant 0 : index
    %c1 = arith.constant 1 : index
    %c0_12 = arith.constant 0 : index
    %c0_13 = arith.constant 0 : index
    %55 = vector.load %arg1[%c0_11, %c1, %c0_12, %c0_13] : memref<4x5x32x32xf32, #tpu.memory_space<vmem>>, vector<1x1x32x32xf32>
    %56 = vector.shape_cast %55 : vector<1x1x32x32xf32> to vector<32x32xf32>
    %cst_14 = arith.constant dense<0.000000e+00> : vector<32x32xf32>
    %57 = tpu.matmul %54, %56, %cst_14 {dimension_numbers = #tpu.dot_dimension_numbers<[1], [0], [0], [1], [0, 0, 1, 1], [], []>} : vector<32x32xf32>, vector<32x32xf32>, vector<32x32xf32> -> vector<32x32xf32>
    %58 = arith.addf %51, %57 : vector<32x32xf32>
    %c0_15 = arith.constant 0 : index
    %c2 = arith.constant 2 : index
    %c0_16 = arith.constant 0 : index
    %c0_17 = arith.constant 0 : index
    %59 = vector.load %arg1[%c0_15, %c2, %c0_16, %c0_17] : memref<4x5x32x32xf32, #tpu.memory_space<vmem>>, vector<1x1x32x32xf32>
    %60 = vector.shape_cast %59 : vector<1x1x32x32xf32> to vector<32x32xf32>
    %cst_18 = arith.constant dense<0.000000e+00> : vector<32x32xf32>
    %61 = tpu.matmul %0, %60, %cst_18 {dimension_numbers = #tpu.dot_dimension_numbers<[1], [0], [0], [1], [0, 0, 1, 1], [], []>} : vector<32x32xf32>, vector<32x32xf32>, vector<32x32xf32> -> vector<32x32xf32>
    %62 = arith.addf %58, %61 : vector<32x32xf32>
    %c31_i32 = arith.constant 31 : i32
    %63 = tpu.dynamic_rotate %0 by %c31_i32 dim 0 : vector<32x32xf32>, i32 -> vector<32x32xf32>
    %64 = vector.broadcast %38 : vector<32x1xf32> to vector<32x32xf32>
    %65 = arith.mulf %63, %64 : vector<32x32xf32>
    %c0_19 = arith.constant 0 : index
    %c3 = arith.constant 3 : index
    %c0_20 = arith.constant 0 : index
    %c0_21 = arith.constant 0 : index
    %66 = vector.load %arg1[%c0_19, %c3, %c0_20, %c0_21] : memref<4x5x32x32xf32, #tpu.memory_space<vmem>>, vector<1x1x32x32xf32>
    %67 = vector.shape_cast %66 : vector<1x1x32x32xf32> to vector<32x32xf32>
    %cst_22 = arith.constant dense<0.000000e+00> : vector<32x32xf32>
    %68 = tpu.matmul %65, %67, %cst_22 {dimension_numbers = #tpu.dot_dimension_numbers<[1], [0], [0], [1], [0, 0, 1, 1], [], []>} : vector<32x32xf32>, vector<32x32xf32>, vector<32x32xf32> -> vector<32x32xf32>
    %69 = arith.addf %62, %68 : vector<32x32xf32>
    %c30_i32 = arith.constant 30 : i32
    %70 = tpu.dynamic_rotate %0 by %c30_i32 dim 0 : vector<32x32xf32>, i32 -> vector<32x32xf32>
    %71 = vector.broadcast %45 : vector<32x1xf32> to vector<32x32xf32>
    %72 = arith.mulf %70, %71 : vector<32x32xf32>
    %c0_23 = arith.constant 0 : index
    %c4 = arith.constant 4 : index
    %c0_24 = arith.constant 0 : index
    %c0_25 = arith.constant 0 : index
    %73 = vector.load %arg1[%c0_23, %c4, %c0_24, %c0_25] : memref<4x5x32x32xf32, #tpu.memory_space<vmem>>, vector<1x1x32x32xf32>
    %74 = vector.shape_cast %73 : vector<1x1x32x32xf32> to vector<32x32xf32>
    %cst_26 = arith.constant dense<0.000000e+00> : vector<32x32xf32>
    %75 = tpu.matmul %72, %74, %cst_26 {dimension_numbers = #tpu.dot_dimension_numbers<[1], [0], [0], [1], [0, 0, 1, 1], [], []>} : vector<32x32xf32>, vector<32x32xf32>, vector<32x32xf32> -> vector<32x32xf32>
    %76 = arith.addf %69, %75 : vector<32x32xf32>
    %c0_27 = arith.constant 0 : index
    %c0_28 = arith.constant 0 : index
    %c0_29 = arith.constant 0 : index
    %77 = vector.load %arg2[%c0_27, %c0_28, %c0_29] : memref<4x1x32xf32, #tpu.memory_space<vmem>>, vector<1x1x32xf32>
    %78 = vector.shape_cast %77 : vector<1x1x32xf32> to vector<1x32xf32>
    %79 = vector.broadcast %78 : vector<1x32xf32> to vector<32x32xf32>
    %80 = arith.addf %76, %79 : vector<32x32xf32>
    %cst_30 = arith.constant 0.000000e+00 : f32
    %81 = vector.broadcast %cst_30 : f32 to vector<32x32xf32>
    %82 = arith.maximumf %80, %81 : vector<32x32xf32>
    %c2_i32_31 = arith.constant 2 : i32
    %83 = tpu.dynamic_rotate %82 by %c2_i32_31 dim 0 : vector<32x32xf32>, i32 -> vector<32x32xf32>
    %84 = vector.broadcast %24 : vector<32x1xf32> to vector<32x32xf32>
    %85 = arith.mulf %83, %84 : vector<32x32xf32>
    %c1_32 = arith.constant 1 : index
    %c0_33 = arith.constant 0 : index
    %c0_34 = arith.constant 0 : index
    %c0_35 = arith.constant 0 : index
    %86 = vector.load %arg1[%c1_32, %c0_33, %c0_34, %c0_35] : memref<4x5x32x32xf32, #tpu.memory_space<vmem>>, vector<1x1x32x32xf32>
    %87 = vector.shape_cast %86 : vector<1x1x32x32xf32> to vector<32x32xf32>
    %cst_36 = arith.constant dense<0.000000e+00> : vector<32x32xf32>
    %88 = tpu.matmul %85, %87, %cst_36 {dimension_numbers = #tpu.dot_dimension_numbers<[1], [0], [0], [1], [0, 0, 1, 1], [], []>} : vector<32x32xf32>, vector<32x32xf32>, vector<32x32xf32> -> vector<32x32xf32>
    %c1_i32_37 = arith.constant 1 : i32
    %89 = tpu.dynamic_rotate %82 by %c1_i32_37 dim 0 : vector<32x32xf32>, i32 -> vector<32x32xf32>
    %90 = vector.broadcast %31 : vector<32x1xf32> to vector<32x32xf32>
    %91 = arith.mulf %89, %90 : vector<32x32xf32>
    %c1_38 = arith.constant 1 : index
    %c1_39 = arith.constant 1 : index
    %c0_40 = arith.constant 0 : index
    %c0_41 = arith.constant 0 : index
    %92 = vector.load %arg1[%c1_38, %c1_39, %c0_40, %c0_41] : memref<4x5x32x32xf32, #tpu.memory_space<vmem>>, vector<1x1x32x32xf32>
    %93 = vector.shape_cast %92 : vector<1x1x32x32xf32> to vector<32x32xf32>
    %cst_42 = arith.constant dense<0.000000e+00> : vector<32x32xf32>
    %94 = tpu.matmul %91, %93, %cst_42 {dimension_numbers = #tpu.dot_dimension_numbers<[1], [0], [0], [1], [0, 0, 1, 1], [], []>} : vector<32x32xf32>, vector<32x32xf32>, vector<32x32xf32> -> vector<32x32xf32>
    %95 = arith.addf %88, %94 : vector<32x32xf32>
    %c1_43 = arith.constant 1 : index
    %c2_44 = arith.constant 2 : index
    %c0_45 = arith.constant 0 : index
    %c0_46 = arith.constant 0 : index
    %96 = vector.load %arg1[%c1_43, %c2_44, %c0_45, %c0_46] : memref<4x5x32x32xf32, #tpu.memory_space<vmem>>, vector<1x1x32x32xf32>
    %97 = vector.shape_cast %96 : vector<1x1x32x32xf32> to vector<32x32xf32>
    %cst_47 = arith.constant dense<0.000000e+00> : vector<32x32xf32>
    %98 = tpu.matmul %82, %97, %cst_47 {dimension_numbers = #tpu.dot_dimension_numbers<[1], [0], [0], [1], [0, 0, 1, 1], [], []>} : vector<32x32xf32>, vector<32x32xf32>, vector<32x32xf32> -> vector<32x32xf32>
    %99 = arith.addf %95, %98 : vector<32x32xf32>
    %c31_i32_48 = arith.constant 31 : i32
    %100 = tpu.dynamic_rotate %82 by %c31_i32_48 dim 0 : vector<32x32xf32>, i32 -> vector<32x32xf32>
    %101 = vector.broadcast %38 : vector<32x1xf32> to vector<32x32xf32>
    %102 = arith.mulf %100, %101 : vector<32x32xf32>
    %c1_49 = arith.constant 1 : index
    %c3_50 = arith.constant 3 : index
    %c0_51 = arith.constant 0 : index
    %c0_52 = arith.constant 0 : index
    %103 = vector.load %arg1[%c1_49, %c3_50, %c0_51, %c0_52] : memref<4x5x32x32xf32, #tpu.memory_space<vmem>>, vector<1x1x32x32xf32>
    %104 = vector.shape_cast %103 : vector<1x1x32x32xf32> to vector<32x32xf32>
    %cst_53 = arith.constant dense<0.000000e+00> : vector<32x32xf32>
    %105 = tpu.matmul %102, %104, %cst_53 {dimension_numbers = #tpu.dot_dimension_numbers<[1], [0], [0], [1], [0, 0, 1, 1], [], []>} : vector<32x32xf32>, vector<32x32xf32>, vector<32x32xf32> -> vector<32x32xf32>
    %106 = arith.addf %99, %105 : vector<32x32xf32>
    %c30_i32_54 = arith.constant 30 : i32
    %107 = tpu.dynamic_rotate %82 by %c30_i32_54 dim 0 : vector<32x32xf32>, i32 -> vector<32x32xf32>
    %108 = vector.broadcast %45 : vector<32x1xf32> to vector<32x32xf32>
    %109 = arith.mulf %107, %108 : vector<32x32xf32>
    %c1_55 = arith.constant 1 : index
    %c4_56 = arith.constant 4 : index
    %c0_57 = arith.constant 0 : index
    %c0_58 = arith.constant 0 : index
    %110 = vector.load %arg1[%c1_55, %c4_56, %c0_57, %c0_58] : memref<4x5x32x32xf32, #tpu.memory_space<vmem>>, vector<1x1x32x32xf32>
    %111 = vector.shape_cast %110 : vector<1x1x32x32xf32> to vector<32x32xf32>
    %cst_59 = arith.constant dense<0.000000e+00> : vector<32x32xf32>
    %112 = tpu.matmul %109, %111, %cst_59 {dimension_numbers = #tpu.dot_dimension_numbers<[1], [0], [0], [1], [0, 0, 1, 1], [], []>} : vector<32x32xf32>, vector<32x32xf32>, vector<32x32xf32> -> vector<32x32xf32>
    %113 = arith.addf %106, %112 : vector<32x32xf32>
    %c1_60 = arith.constant 1 : index
    %c0_61 = arith.constant 0 : index
    %c0_62 = arith.constant 0 : index
    %114 = vector.load %arg2[%c1_60, %c0_61, %c0_62] : memref<4x1x32xf32, #tpu.memory_space<vmem>>, vector<1x1x32xf32>
    %115 = vector.shape_cast %114 : vector<1x1x32xf32> to vector<1x32xf32>
    %116 = vector.broadcast %115 : vector<1x32xf32> to vector<32x32xf32>
    %117 = arith.addf %113, %116 : vector<32x32xf32>
    %cst_63 = arith.constant 0.000000e+00 : f32
    %118 = vector.broadcast %cst_63 : f32 to vector<32x32xf32>
    %119 = arith.maximumf %117, %118 : vector<32x32xf32>
    %120 = arith.addf %119, %0 : vector<32x32xf32>
    %c2_i32_64 = arith.constant 2 : i32
    %121 = tpu.dynamic_rotate %120 by %c2_i32_64 dim 0 : vector<32x32xf32>, i32 -> vector<32x32xf32>
    %122 = vector.broadcast %24 : vector<32x1xf32> to vector<32x32xf32>
    %123 = arith.mulf %121, %122 : vector<32x32xf32>
    %c2_65 = arith.constant 2 : index
    %c0_66 = arith.constant 0 : index
    %c0_67 = arith.constant 0 : index
    %c0_68 = arith.constant 0 : index
    %124 = vector.load %arg1[%c2_65, %c0_66, %c0_67, %c0_68] : memref<4x5x32x32xf32, #tpu.memory_space<vmem>>, vector<1x1x32x32xf32>
    %125 = vector.shape_cast %124 : vector<1x1x32x32xf32> to vector<32x32xf32>
    %cst_69 = arith.constant dense<0.000000e+00> : vector<32x32xf32>
    %126 = tpu.matmul %123, %125, %cst_69 {dimension_numbers = #tpu.dot_dimension_numbers<[1], [0], [0], [1], [0, 0, 1, 1], [], []>} : vector<32x32xf32>, vector<32x32xf32>, vector<32x32xf32> -> vector<32x32xf32>
    %c1_i32_70 = arith.constant 1 : i32
    %127 = tpu.dynamic_rotate %120 by %c1_i32_70 dim 0 : vector<32x32xf32>, i32 -> vector<32x32xf32>
    %128 = vector.broadcast %31 : vector<32x1xf32> to vector<32x32xf32>
    %129 = arith.mulf %127, %128 : vector<32x32xf32>
    %c2_71 = arith.constant 2 : index
    %c1_72 = arith.constant 1 : index
    %c0_73 = arith.constant 0 : index
    %c0_74 = arith.constant 0 : index
    %130 = vector.load %arg1[%c2_71, %c1_72, %c0_73, %c0_74] : memref<4x5x32x32xf32, #tpu.memory_space<vmem>>, vector<1x1x32x32xf32>
    %131 = vector.shape_cast %130 : vector<1x1x32x32xf32> to vector<32x32xf32>
    %cst_75 = arith.constant dense<0.000000e+00> : vector<32x32xf32>
    %132 = tpu.matmul %129, %131, %cst_75 {dimension_numbers = #tpu.dot_dimension_numbers<[1], [0], [0], [1], [0, 0, 1, 1], [], []>} : vector<32x32xf32>, vector<32x32xf32>, vector<32x32xf32> -> vector<32x32xf32>
    %133 = arith.addf %126, %132 : vector<32x32xf32>
    %c2_76 = arith.constant 2 : index
    %c2_77 = arith.constant 2 : index
    %c0_78 = arith.constant 0 : index
    %c0_79 = arith.constant 0 : index
    %134 = vector.load %arg1[%c2_76, %c2_77, %c0_78, %c0_79] : memref<4x5x32x32xf32, #tpu.memory_space<vmem>>, vector<1x1x32x32xf32>
    %135 = vector.shape_cast %134 : vector<1x1x32x32xf32> to vector<32x32xf32>
    %cst_80 = arith.constant dense<0.000000e+00> : vector<32x32xf32>
    %136 = tpu.matmul %120, %135, %cst_80 {dimension_numbers = #tpu.dot_dimension_numbers<[1], [0], [0], [1], [0, 0, 1, 1], [], []>} : vector<32x32xf32>, vector<32x32xf32>, vector<32x32xf32> -> vector<32x32xf32>
    %137 = arith.addf %133, %136 : vector<32x32xf32>
    %c31_i32_81 = arith.constant 31 : i32
    %138 = tpu.dynamic_rotate %120 by %c31_i32_81 dim 0 : vector<32x32xf32>, i32 -> vector<32x32xf32>
    %139 = vector.broadcast %38 : vector<32x1xf32> to vector<32x32xf32>
    %140 = arith.mulf %138, %139 : vector<32x32xf32>
    %c2_82 = arith.constant 2 : index
    %c3_83 = arith.constant 3 : index
    %c0_84 = arith.constant 0 : index
    %c0_85 = arith.constant 0 : index
    %141 = vector.load %arg1[%c2_82, %c3_83, %c0_84, %c0_85] : memref<4x5x32x32xf32, #tpu.memory_space<vmem>>, vector<1x1x32x32xf32>
    %142 = vector.shape_cast %141 : vector<1x1x32x32xf32> to vector<32x32xf32>
    %cst_86 = arith.constant dense<0.000000e+00> : vector<32x32xf32>
    %143 = tpu.matmul %140, %142, %cst_86 {dimension_numbers = #tpu.dot_dimension_numbers<[1], [0], [0], [1], [0, 0, 1, 1], [], []>} : vector<32x32xf32>, vector<32x32xf32>, vector<32x32xf32> -> vector<32x32xf32>
    %144 = arith.addf %137, %143 : vector<32x32xf32>
    %c30_i32_87 = arith.constant 30 : i32
    %145 = tpu.dynamic_rotate %120 by %c30_i32_87 dim 0 : vector<32x32xf32>, i32 -> vector<32x32xf32>
    %146 = vector.broadcast %45 : vector<32x1xf32> to vector<32x32xf32>
    %147 = arith.mulf %145, %146 : vector<32x32xf32>
    %c2_88 = arith.constant 2 : index
    %c4_89 = arith.constant 4 : index
    %c0_90 = arith.constant 0 : index
    %c0_91 = arith.constant 0 : index
    %148 = vector.load %arg1[%c2_88, %c4_89, %c0_90, %c0_91] : memref<4x5x32x32xf32, #tpu.memory_space<vmem>>, vector<1x1x32x32xf32>
    %149 = vector.shape_cast %148 : vector<1x1x32x32xf32> to vector<32x32xf32>
    %cst_92 = arith.constant dense<0.000000e+00> : vector<32x32xf32>
    %150 = tpu.matmul %147, %149, %cst_92 {dimension_numbers = #tpu.dot_dimension_numbers<[1], [0], [0], [1], [0, 0, 1, 1], [], []>} : vector<32x32xf32>, vector<32x32xf32>, vector<32x32xf32> -> vector<32x32xf32>
    %151 = arith.addf %144, %150 : vector<32x32xf32>
    %c2_93 = arith.constant 2 : index
    %c0_94 = arith.constant 0 : index
    %c0_95 = arith.constant 0 : index
    %152 = vector.load %arg2[%c2_93, %c0_94, %c0_95] : memref<4x1x32xf32, #tpu.memory_space<vmem>>, vector<1x1x32xf32>
    %153 = vector.shape_cast %152 : vector<1x1x32xf32> to vector<1x32xf32>
    %154 = vector.broadcast %153 : vector<1x32xf32> to vector<32x32xf32>
    %155 = arith.addf %151, %154 : vector<32x32xf32>
    %cst_96 = arith.constant 0.000000e+00 : f32
    %156 = vector.broadcast %cst_96 : f32 to vector<32x32xf32>
    %157 = arith.maximumf %155, %156 : vector<32x32xf32>
    %c2_i32_97 = arith.constant 2 : i32
    %158 = tpu.dynamic_rotate %157 by %c2_i32_97 dim 0 : vector<32x32xf32>, i32 -> vector<32x32xf32>
    %159 = vector.broadcast %24 : vector<32x1xf32> to vector<32x32xf32>
    %160 = arith.mulf %158, %159 : vector<32x32xf32>
    %c3_98 = arith.constant 3 : index
    %c0_99 = arith.constant 0 : index
    %c0_100 = arith.constant 0 : index
    %c0_101 = arith.constant 0 : index
    %161 = vector.load %arg1[%c3_98, %c0_99, %c0_100, %c0_101] : memref<4x5x32x32xf32, #tpu.memory_space<vmem>>, vector<1x1x32x32xf32>
    %162 = vector.shape_cast %161 : vector<1x1x32x32xf32> to vector<32x32xf32>
    %cst_102 = arith.constant dense<0.000000e+00> : vector<32x32xf32>
    %163 = tpu.matmul %160, %162, %cst_102 {dimension_numbers = #tpu.dot_dimension_numbers<[1], [0], [0], [1], [0, 0, 1, 1], [], []>} : vector<32x32xf32>, vector<32x32xf32>, vector<32x32xf32> -> vector<32x32xf32>
    %c1_i32_103 = arith.constant 1 : i32
    %164 = tpu.dynamic_rotate %157 by %c1_i32_103 dim 0 : vector<32x32xf32>, i32 -> vector<32x32xf32>
    %165 = vector.broadcast %31 : vector<32x1xf32> to vector<32x32xf32>
    %166 = arith.mulf %164, %165 : vector<32x32xf32>
    %c3_104 = arith.constant 3 : index
    %c1_105 = arith.constant 1 : index
    %c0_106 = arith.constant 0 : index
    %c0_107 = arith.constant 0 : index
    %167 = vector.load %arg1[%c3_104, %c1_105, %c0_106, %c0_107] : memref<4x5x32x32xf32, #tpu.memory_space<vmem>>, vector<1x1x32x32xf32>
    %168 = vector.shape_cast %167 : vector<1x1x32x32xf32> to vector<32x32xf32>
    %cst_108 = arith.constant dense<0.000000e+00> : vector<32x32xf32>
    %169 = tpu.matmul %166, %168, %cst_108 {dimension_numbers = #tpu.dot_dimension_numbers<[1], [0], [0], [1], [0, 0, 1, 1], [], []>} : vector<32x32xf32>, vector<32x32xf32>, vector<32x32xf32> -> vector<32x32xf32>
    %170 = arith.addf %163, %169 : vector<32x32xf32>
    %c3_109 = arith.constant 3 : index
    %c2_110 = arith.constant 2 : index
    %c0_111 = arith.constant 0 : index
    %c0_112 = arith.constant 0 : index
    %171 = vector.load %arg1[%c3_109, %c2_110, %c0_111, %c0_112] : memref<4x5x32x32xf32, #tpu.memory_space<vmem>>, vector<1x1x32x32xf32>
    %172 = vector.shape_cast %171 : vector<1x1x32x32xf32> to vector<32x32xf32>
    %cst_113 = arith.constant dense<0.000000e+00> : vector<32x32xf32>
    %173 = tpu.matmul %157, %172, %cst_113 {dimension_numbers = #tpu.dot_dimension_numbers<[1], [0], [0], [1], [0, 0, 1, 1], [], []>} : vector<32x32xf32>, vector<32x32xf32>, vector<32x32xf32> -> vector<32x32xf32>
    %174 = arith.addf %170, %173 : vector<32x32xf32>
    %c31_i32_114 = arith.constant 31 : i32
    %175 = tpu.dynamic_rotate %157 by %c31_i32_114 dim 0 : vector<32x32xf32>, i32 -> vector<32x32xf32>
    %176 = vector.broadcast %38 : vector<32x1xf32> to vector<32x32xf32>
    %177 = arith.mulf %175, %176 : vector<32x32xf32>
    %c3_115 = arith.constant 3 : index
    %c3_116 = arith.constant 3 : index
    %c0_117 = arith.constant 0 : index
    %c0_118 = arith.constant 0 : index
    %178 = vector.load %arg1[%c3_115, %c3_116, %c0_117, %c0_118] : memref<4x5x32x32xf32, #tpu.memory_space<vmem>>, vector<1x1x32x32xf32>
    %179 = vector.shape_cast %178 : vector<1x1x32x32xf32> to vector<32x32xf32>
    %cst_119 = arith.constant dense<0.000000e+00> : vector<32x32xf32>
    %180 = tpu.matmul %177, %179, %cst_119 {dimension_numbers = #tpu.dot_dimension_numbers<[1], [0], [0], [1], [0, 0, 1, 1], [], []>} : vector<32x32xf32>, vector<32x32xf32>, vector<32x32xf32> -> vector<32x32xf32>
    %181 = arith.addf %174, %180 : vector<32x32xf32>
    %c30_i32_120 = arith.constant 30 : i32
    %182 = tpu.dynamic_rotate %157 by %c30_i32_120 dim 0 : vector<32x32xf32>, i32 -> vector<32x32xf32>
    %183 = vector.broadcast %45 : vector<32x1xf32> to vector<32x32xf32>
    %184 = arith.mulf %182, %183 : vector<32x32xf32>
    %c3_121 = arith.constant 3 : index
    %c4_122 = arith.constant 4 : index
    %c0_123 = arith.constant 0 : index
    %c0_124 = arith.constant 0 : index
    %185 = vector.load %arg1[%c3_121, %c4_122, %c0_123, %c0_124] : memref<4x5x32x32xf32, #tpu.memory_space<vmem>>, vector<1x1x32x32xf32>
    %186 = vector.shape_cast %185 : vector<1x1x32x32xf32> to vector<32x32xf32>
    %cst_125 = arith.constant dense<0.000000e+00> : vector<32x32xf32>
    %187 = tpu.matmul %184, %186, %cst_125 {dimension_numbers = #tpu.dot_dimension_numbers<[1], [0], [0], [1], [0, 0, 1, 1], [], []>} : vector<32x32xf32>, vector<32x32xf32>, vector<32x32xf32> -> vector<32x32xf32>
    %188 = arith.addf %181, %187 : vector<32x32xf32>
    %c3_126 = arith.constant 3 : index
    %c0_127 = arith.constant 0 : index
    %c0_128 = arith.constant 0 : index
    %189 = vector.load %arg2[%c3_126, %c0_127, %c0_128] : memref<4x1x32xf32, #tpu.memory_space<vmem>>, vector<1x1x32xf32>
    %190 = vector.shape_cast %189 : vector<1x1x32xf32> to vector<1x32xf32>
    %191 = vector.broadcast %190 : vector<1x32xf32> to vector<32x32xf32>
    %192 = arith.addf %188, %191 : vector<32x32xf32>
    %cst_129 = arith.constant 0.000000e+00 : f32
    %193 = vector.broadcast %cst_129 : f32 to vector<32x32xf32>
    %194 = arith.maximumf %192, %193 : vector<32x32xf32>
    %195 = arith.addf %194, %120 : vector<32x32xf32>
    %c0_130 = arith.constant 0 : index
    %c0_131 = arith.constant 0 : index
    %196 = vector.load %arg3[%c0_130, %c0_131] : memref<32x128xf32, #tpu.memory_space<vmem>>, vector<32x128xf32>
    %cst_132 = arith.constant dense<0.000000e+00> : vector<32x128xf32>
    %197 = tpu.matmul %195, %196, %cst_132 {dimension_numbers = #tpu.dot_dimension_numbers<[1], [0], [0], [1], [0, 0, 1, 1], [], []>} : vector<32x32xf32>, vector<32x128xf32>, vector<32x128xf32> -> vector<32x128xf32>
    %c0_133 = arith.constant 0 : index
    %c0_134 = arith.constant 0 : index
    %198 = vector.load %arg4[%c0_133, %c0_134] : memref<1x128xf32, #tpu.memory_space<vmem>>, vector<1x128xf32>
    %199 = vector.broadcast %198 : vector<1x128xf32> to vector<32x128xf32>
    %200 = arith.addf %197, %199 : vector<32x128xf32>
    %c0_135 = arith.constant 0 : index
    %c0_136 = arith.constant 0 : index
    %201 = vector.load %arg5[%c0_135, %c0_136] : memref<32x128xf32, #tpu.memory_space<vmem>>, vector<32x128xf32>
    tpu.vector_store %arg5[%c0_135, %c0_136], %200 {strides = array<i32>} : memref<32x128xf32, #tpu.memory_space<vmem>>, vector<32x128xf32>,
    return
  }
}

</mosaic_0001>

<bundles_post_ra>
// kernel: conv_decoder_hubert.1
= control target key start
LH: loop header
LB: loop body
LE: loop exit
PB: predicated region body
PF: predicated region fallthrough
CT: control target
= control target key end

     0   :  { %10 = vsyncpa [#allocation3], 0  ;;  %s4088_s0 = inlined_call_operand.hbm [shape: f32[32,32], index: 0, kind: input, shape index: {}]   ;;  %s4089_s1 = inlined_call_operand.hbm [shape: f32[4,5,32,32], index: 1, kind: input, shape index: {}]   ;;  %s4090_s2 = inlined_call_operand.vmem [shape: f32[4,1,32], index: 2, kind: input, shape index: {}]   ;;  %s4091_s3 = inlined_call_operand.hbm [shape: f32[32,128], index: 3, kind: input, shape index: {}]   ;;  %s4092_s4 = inlined_call_operand.vmem [shape: f32[1,128], index: 4, kind: input, shape index: {}]   ;;  %s4093_s5 = inlined_call_operand.vmem [shape: f32[32,128], index: 5, kind: output, shape index: {}]  }
   0x1   :  { %11 = vsyncpa [#allocation5], 0  ;;  %s3545_s18 = smov [#allocation4]   ;;  %s3546_s20 = smov [#allocation2]  }
   0x2   :  { %s29_s19 = sshll.u32 %s3545_s18, 4  ;;  %s17_s21 = sshll.u32 %s3546_s20, 4  ;;  %s30_s19 = int_to_ptr.vmem [resolvable:$true] %s29_s19  ;;  %s3581_s21 = int_to_ptr.vmem [resolvable:$true] %s17_s21 }
   0x3   :  { %s3475_s24 = scalar_lea.hbm %s4089_s1, 10240 }
   0x4   :  { %p3476_p0 = scmp.ne.s32.totalorder %s4089_s1, %s3475_s24  ;;  %p3479_p1 = scmp.lt.u32.totalorder %s3475_s24, %s4089_s1 }
   0x6   :  { %p3481_p2 = pnand %p3479_p1, %p3476_p0 }
   0x8   :  { %3484 = shalt.err (!%p3481_p2)
}
   0x9   :  { %s3485_s29 = scalar_lea.vmem %s30_s19, 10240  ;;  %p3490_p4 = scmp.lt.s32.totalorder %s30_s19, %s30_s19 }
   0xa   :  { %p3486_p3 = scmp.ne.s32.totalorder %s30_s19, %s3485_s29  ;;  %p3491_p5 = scmp.lt.s32.totalorder %s3485_s29, %s3485_s29 }
   0xc   :  { %p3492_p6 = por %p3491_p5, %p3490_p4 }
   0xe   :  { %p3493_p7 = pnand %p3492_p6, %p3486_p3 }
  0x10   :  { %3496 = shalt.err (!%p3493_p7)
}
  0x11   :  { %s3547_s30 = smov 128   ;;  %s3548_s6 = smov 8  }
  0x12   :  { %35 = dma.hbm_to_vmem [thread:$0]  %s4089_s1, 10240, %s30_s19, [#allocation5], %s3547_s30, %s3547_s30, %s3548_s6  }
  0x13   :  { %s3497_s11 = scalar_lea.hbm %s4088_s0, 512 }
  0x14   :  { %p3498_p8 = scmp.ne.s32.totalorder %s4088_s0, %s3497_s11  ;;  %p3501_p9 = scmp.lt.u32.totalorder %s3497_s11, %s4088_s0 }
  0x16   :  { %p3503_p10 = pnand %p3501_p9, %p3498_p8 }
  0x18   :  { %3506 = shalt.err (!%p3503_p10)
}
  0x19   :  { %s3507_s16 = scalar_lea.vmem %s3581_s21, 512  ;;  %p3512_p12 = scmp.lt.s32.totalorder %s3581_s21, %s3581_s21 }
  0x1a   :  { %p3508_p11 = scmp.ne.s32.totalorder %s3581_s21, %s3507_s16  ;;  %p3513_p13 = scmp.lt.s32.totalorder %s3507_s16, %s3507_s16 }
  0x1c   :  { %p3514_p0 = por %p3513_p13, %p3512_p12 }
  0x1e   :  { %p3515_p1 = pnand %p3514_p0, %p3508_p11 }
  0x20   :  { %3518 = shalt.err (!%p3515_p1)
}
  0x21   :  { %23 = dma.hbm_to_vmem [thread:$0]  %s4088_s0, 512, %s3581_s21, [#allocation3], %s3547_s30, %s3547_s30, %s3548_s6  }
  0x22   :  { %s3549_s18 = smov [#allocation6]   ;;  %s3519_s23 = scalar_lea.hbm %s4091_s3, 512 }
  0x23   :  { %s43_s19 = sshll.u32 %s3549_s18, 4  ;;  %p3520_p2 = scmp.ne.s32.totalorder %s4091_s3, %s3519_s23  ;;  %s44_s19 = int_to_ptr.vmem [resolvable:$true] %s43_s19 }
  0x24   :  { %p3523_p3 = scmp.lt.u32.totalorder %s3519_s23, %s4091_s3 }
  0x26   :  { %p3525_p4 = pnand %p3523_p3, %p3520_p2 }
  0x28   :  { %3528 = shalt.err (!%p3525_p4)
}
  0x29   :  { %s3529_s28 = scalar_lea.vmem %s44_s19, 512  ;;  %p3534_p6 = scmp.lt.s32.totalorder %s44_s19, %s44_s19 }
  0x2a   :  { %p3530_p5 = scmp.ne.s32.totalorder %s44_s19, %s3529_s28  ;;  %p3535_p7 = scmp.lt.s32.totalorder %s3529_s28, %s3529_s28 }
  0x2c   :  { %p3536_p8 = por %p3535_p7, %p3534_p6 }
  0x2e   :  { %p3537_p9 = pnand %p3536_p8, %p3530_p5 }
  0x30   :  { %3540 = shalt.err (!%p3537_p9)
}
  0x31   :  { %49 = dma.hbm_to_vmem [thread:$0]  %s4091_s3, 512, %s44_s19, [#allocation5], %s3547_s30, %s3547_s30, %s3548_s6  }
  0x32   :  { %3541 = dma.done.wait [#allocation3], 512  }
  0x33   :  { %3542 = vsyncadd [#allocation3], 4294966784 }
  0x34   :  { %3543 = dma.done.wait [#allocation5], 10752  }
  0x35   :  { %3544 = vsyncadd [#allocation5], 4294956544  ;;  %v65_v0 = vlaneseq  ;;  %v229_v5 = vld [vmem:[#allocation4 + $0x20] sm:$0xff]  ;;  %v230_v6 = vld [vmem:[#allocation4 + $0x28] sm:$0xff]  ;;  %v3550_v14 = vmov 0.0   ;;  %vm233_vm3 = vcmask 261120  }
  0x36   :  { %v231_v7 = vld [vmem:[#allocation4 + $0x30] sm:$0xff]  ;;  %v3233_v8 = vpack.c.bf16 %v230_v6, %v229_v5  ;;  %v232_v9 = vld [vmem:[#allocation4 + $0x38] sm:$0xff]  ;;  %v3637_v10 = vld [vmem:[#allocation2] sm:$0xff] }
  0x37   :  { %v3633_v1 = vshrl.u32 %v65_v0, 7  ;;  %v3639_v11 = vld [vmem:[#allocation2 + $0x18] sm:$0xff]  ;;  %v3237_v13 = vpack.c.bf16 %v232_v9, %v231_v7  ;;  %v215_v16 = vrot.slane %v3637_v10, 7  ;;  %v3651_v18 = vld [vmem:[#allocation2 + $0x8] sm:$0xff]  ;;  %v211_v19 = vld [vmem:[#allocation4] sm:$0xff]  ;;  %v198_v29 = vrot.slane %v3637_v10, 6 }
  0x38   :  { %v218_v17 = vrot.slane %v3639_v11, 7  ;;  %v212_v20 = vld [vmem:[#allocation4 + $0x8] sm:$0xff]  ;;  %3234 = vmatprep.subr.bf16.mxu0 %v3233_v8  ;;  %v216_v21 = vrot.slane %v3651_v18, 7  ;;  %v3654_v22 = vld [vmem:[#allocation2 + $0x10] sm:$0xff]  ;;  %v201_v30 = vrot.slane %v3639_v11, 6  ;;  %v214_v33 = vld [vmem:[#allocation4 + $0x18] sm:$0xff] }
  0x39   :  { %v74_v2 = vand.u32 15, %v3633_v1  ;;  %v68_v3 = vadd.s32 16, %v3633_v1  ;;  %vm219_vm1 = vcmp.lt.s32.totalorder %v3633_v1, 1  ;;  %3236 = vmatpush3.bf16.msra.mxu0 %v3233_v8  ;;  %v217_v26 = vrot.slane %v3654_v22, 7  ;;  %v213_v32 = vld [vmem:[#allocation4 + $0x10] sm:$0xff]  ;;  %v429_v41 = vld [vmem:[#allocation4 + $0x40] sm:$0xff] }
  0x3a   :  { %v223_v24 = vsel %vm219_vm1, %v218_v17, %v215_v16  ;;  %3238 = vmatprep.subr.bf16.mxu0 %v3237_v13  ;;  %v3241_v28 = vpack.c.bf16 %v212_v20, %v211_v19  ;;  %vm202_vm5 = vcmp.lt.s32.totalorder %v3633_v1, 2  ;;  %v222_v34 = vsel %vm219_vm1, %v215_v16, %v216_v21  ;;  %v430_v42 = vld [vmem:[#allocation4 + $0x48] sm:$0xff]  ;;  %v431_v48 = vld [vmem:[#allocation4 + $0x50] sm:$0xff]  ;;  %v432_v49 = vld [vmem:[#allocation4 + $0x58] sm:$0xff] }
  0x3b   :  { %vm138_vm0 = vcmp.ge.s32.totalorder %v74_v2, 1  ;;  %v88_v4 = vand.u32 15, %v68_v3  ;;  %vm3656_vm4 = vcmp.ge.s32.totalorder %v74_v2, 2  ;;  %v221_v31 = vsel %vm219_vm1, %v216_v21, %v217_v26  ;;  %v548_v54 = vld [vmem:[#allocation4 + $0x60] sm:$0xff]  ;;  %v549_v55 = vld [vmem:[#allocation4 + $0x68] sm:$0xff]  ;;  %v550_v60 = vld [vmem:[#allocation4 + $0x70] sm:$0xff] }
  0x3c   :  { %v3647_v15 = vsel %vm138_vm0, 1.0, %v3550_v14  ;;  %v3681_v36 = vsel %vm3656_vm4, 1.0, %v3550_v14  ;;  %v3245_v37 = vpack.c.bf16 %v214_v33, %v213_v32  ;;  %v206_v38 = vsel %vm202_vm5, %v201_v30, %v198_v29  ;;  %v551_v61 = vld [vmem:[#allocation4 + $0x78] sm:$0xff]  ;;  %v668_v5 = vld [vmem:[#allocation4 + $0x88] sm:$0xff] }
  0x3d   :  { %vm3642_vm2 = vcmp.ge.s32.totalorder %v88_v4, 1  ;;  %v224_v27 = vmul.f32 %v3647_v15, %v223_v24  ;;  %3240 = vmatpush3.bf16.msra.mxu0 %v3237_v13  ;;  %v199_v39 = vrot.slane %v3651_v18, 6  ;;  %v200_v40 = vrot.slane %v3654_v22, 6  ;;  %v669_v13 = vld [vmem:[#allocation4 + $0x90] sm:$0xff]  ;;  %v670_v16 = vld [vmem:[#allocation4 + $0x98] sm:$0xff] }
  0x3e   :  { %v3665_v25 = vsel %vm3642_vm2, 1.0, %v3550_v14  ;;  %3242 = vmatprep.subr.bf16.mxu0 %v3241_v28  ;;  %vm120_vm6 = vcmp.ge.s32.totalorder %v88_v4, 2  ;;  %v220_v43 = vsel %vm219_vm1, %v217_v26, %v218_v17  ;;  %v207_v44 = vmul.f32 %v3681_v36, %v206_v38  ;;  %v667_v4 = vld [vmem:[#allocation4 + $0x80] sm:$0xff] }
  0x3f   :  { %2947 = vmatprep.mubr.msk.f32.mxu0 %vm233_vm3, %v224_v27  ;;  %v226_v35 = vmul.f32 %v3665_v25, %v221_v31  ;;  %v3249_v45 = vpack.c.bf16 %v430_v42, %v429_v41  ;;  %v3693_v46 = vsel %vm120_vm6, 1.0, %v3550_v14  ;;  %v204_v47 = vsel %vm202_vm5, %v199_v39, %v200_v40  ;;  %v820_v42 = vld [vmem:[#allocation4 + $0xd8] sm:$0xff] }
  0x40   :  { %2948 = vmatmul.mubr.msk.f32.vlgmr.msra.gmra.mrb[0].mxu0 %vm233_vm3, %v222_v34  ;;  %v205_v50 = vsel %vm202_vm5, %v198_v29, %v199_v39  ;;  %v209_v51 = vmul.f32 %v3693_v46, %v204_v47  ;;  %v3253_v52 = vpack.c.bf16 %v432_v49, %v431_v48  ;;  %v67_v53 = vadd.s32 8, %v3633_v1  ;;  %v817_v39 = vld [vmem:[#allocation4 + $0xc0] sm:$0xff] }
  0x41   :  { %3244 = vmatpush3.bf16.msra.mxu0 %v3241_v28  ;;  %2950 = vmatprep.mubr.msk.f32.mxu0 %vm233_vm3, %v226_v35  ;;  %v203_v56 = vsel %vm202_vm5, %v200_v40, %v201_v30  ;;  %v3257_v57 = vpack.c.bf16 %v549_v55, %v548_v54  ;;  %v69_v59 = vadd.s32 24, %v3633_v1  ;;  %v535_v62 = vrot.slane %v3651_v18, 1  ;;  %v818_v40 = vld [vmem:[#allocation4 + $0xc8] sm:$0xff]  ;;  %v2699_v48 = vld [vmem:[%s4090_s2] ss:$0 sm:$0xff] }
  0x42   :  { %3246 = vmatprep.subr.bf16.mxu0 %v3245_v37  ;;  %v81_v58 = vand.u32 15, %v67_v53  ;;  %v536_v63 = vrot.slane %v3654_v22, 1  ;;  %vm538_vm7 = vcmp.lt.s32.totalorder %v3633_v1, 7  ;;  %v3261_v0 = vpack.c.bf16 %v551_v61, %v550_v60 }
  0x43   :  { %v534_v2 = vrot.slane %v3637_v10, 1  ;;  %v95_v3 = vand.u32 15, %v69_v59  ;;  %v537_v8 = vrot.slane %v3639_v11, 1  ;;  %v3265_v12 = vpack.c.bf16 %v668_v5, %v667_v4 }
  0x44   :  { %2951 = vmatmul.mubr.msk.f32.gmra.mrb[2].mxu0 %vm233_vm3, %v220_v43  ;;  %vm163_vm8 = vcmp.lt.s32.totalorder %v81_v58, 15  ;;  %v540_v7 = vsel %vm538_vm7, %v535_v62, %v536_v63  ;;  %vm657_vm10 = vcmp.lt.s32.totalorder %v3633_v1, 6  ;;  %v654_v21 = vrot.slane %v3651_v18, 2  ;;  %v2310_v1 = vld [vmem:[#allocation4 + $0x240] sm:$0xff] }
  0x45   :  { %3248 = vmatpush3.bf16.msra.mxu0 %v3245_v37  ;;  %2961 = vmatprep.mubr.msk.f32.mxu0 %vm233_vm3, %v207_v44  ;;  %v3720_v6 = vsel %vm163_vm8, 1.0, %v3550_v14  ;;  %v541_v9 = vsel %vm538_vm7, %v534_v2, %v535_v62  ;;  %vm165_vm9 = vcmp.lt.s32.totalorder %v95_v3, 15  ;;  %v542_v20 = vsel %vm538_vm7, %v537_v8, %v534_v2  ;;  %v800_v44 = vld [vmem:[#allocation4 + $0xa0] sm:$0xff] }
  0x46   :  { %3250 = vmatprep.subr.bf16.mxu0 %v3249_v45  ;;  %v544_v17 = vmul.f32 %v3720_v6, %v540_v7  ;;  %v3733_v19 = vsel %vm165_vm9, 1.0, %v3550_v14  ;;  %v655_v23 = vrot.slane %v3654_v22, 2  ;;  %v539_v24 = vsel %vm538_vm7, %v536_v63, %v537_v8 }
  0x47   :  { %v3269_v26 = vpack.c.bf16 %v670_v16, %v669_v13  ;;  %vm183_vm11 = vcmp.lt.s32.totalorder %v81_v58, 14  ;;  %v653_v27 = vrot.slane %v3637_v10, 2  ;;  %v546_v28 = vmul.f32 %v3733_v19, %v542_v20  ;;  %v802_v13 = vld [vmem:[#allocation4 + $0xb0] sm:$0xff]  ;;  %v803_v16 = vld [vmem:[#allocation4 + $0xb8] sm:$0xff] }
  0x48   :  { %2962 = vmatmul.mubr.msk.f32.vlgmr.msra.gmra.mrb[0].mxu0 %vm233_vm3, %v205_v50  ;;  %v3746_v29 = vsel %vm183_vm11, 1.0, %v3550_v14  ;;  %v659_v30 = vsel %vm657_vm10, %v654_v21, %v655_v23  ;;  %v656_v31 = vrot.slane %v3639_v11, 2  ;;  %vm185_vm12 = vcmp.lt.s32.totalorder %v95_v3, 14 }
  0x49   :  { %3252 = vmatpush3.bf16.msra.mxu0 %v3249_v45  ;;  %2964 = vmatprep.mubr.msk.f32.mxu0 %vm233_vm3, %v209_v51  ;;  %v660_v32 = vsel %vm657_vm10, %v653_v27, %v654_v21  ;;  %v663_v33 = vmul.f32 %v3746_v29, %v659_v30  ;;  %v3757_v34 = vsel %vm185_vm12, 1.0, %v3550_v14  ;;  %v3273_v41 = vpack.c.bf16 %v818_v40, %v817_v39  ;;  %v819_v14 = vld [vmem:[#allocation4 + $0xd0] sm:$0xff]  ;;  %v801_v45 = vld [vmem:[#allocation4 + $0xa8] sm:$0xff] }
  0x4a   :  { %3254 = vmatprep.subr.bf16.mxu0 %v3253_v52  ;;  %v661_v35 = vsel %vm657_vm10, %v656_v31, %v653_v27  ;;  %v658_v37 = vsel %vm657_vm10, %v655_v23, %v656_v31  ;;  %v3277_v43 = vpack.c.bf16 %v820_v42, %v819_v14  ;;  %v3281_v47 = vpack.c.bf16 %v801_v45, %v800_v44  ;;  %v1016_v42 = vld [vmem:[#allocation4 + $0xe0] sm:$0xff] }
  0x4b   :  { %v665_v38 = vmul.f32 %v3757_v34, %v661_v35  ;;  %3274 = vmatprep.subr.bf16.mxu1 %v3273_v41 }
  0x4c   :  { %2965 = vmatmul.mubr.msk.f32.gmra.mrb[2].mxu0 %vm233_vm3, %v203_v56  ;;  %3276 = vmatpush3.bf16.msra.mxu1 %v3273_v41 }
  0x4d   :  { %3256 = vmatpush3.bf16.msra.mxu0 %v3253_v52  ;;  %2975 = vmatprep.mubr.msk.f32.mxu0 %vm233_vm3, %v3637_v10 }
  0x4e   :  { %3258 = vmatprep.subr.bf16.mxu0 %v3257_v57  ;;  %3278 = vmatprep.subr.bf16.mxu1 %v3277_v43 }
  0x50   :  { %2976 = vmatmul.mubr.msk.f32.vlgmr.msra.gmra.mrb[0].mxu0 %vm233_vm3, %v3651_v18  ;;  %3280 = vmatpush3.bf16.msra.mxu1 %v3277_v43  ;;  %v1017_v43 = vld [vmem:[#allocation4 + $0xe8] sm:$0xff] }
  0x51   :  { %3260 = vmatpush3.bf16.msra.mxu0 %v3257_v57  ;;  %2978 = vmatprep.mubr.msk.f32.mxu0 %vm233_vm3, %v3654_v22 }
  0x52   :  { %3262 = vmatprep.subr.bf16.mxu0 %v3261_v0  ;;  %3282 = vmatprep.subr.bf16.mxu1 %v3281_v47 }
  0x54   :  { %2979 = vmatmul.mubr.msk.f32.gmra.mrb[2].mxu0 %vm233_vm3, %v3639_v11 }
  0x55   :  { %3264 = vmatpush3.bf16.msra.mxu0 %v3261_v0  ;;  %2989 = vmatprep.mubr.msk.f32.mxu0 %vm233_vm3, %v541_v9 }
  0x56   :  { %3266 = vmatprep.subr.bf16.mxu0 %v3265_v12 }
  0x58   :  { %2990 = vmatmul.mubr.msk.f32.vlgmr.msra.gmra.mrb[0].mxu0 %vm233_vm3, %v544_v17 }
  0x59   :  { %3268 = vmatpush3.bf16.msra.mxu0 %v3265_v12  ;;  %2992 = vmatprep.mubr.msk.f32.mxu0 %vm233_vm3, %v539_v24 }
  0x5a   :  { %3270 = vmatprep.subr.bf16.mxu0 %v3269_v26 }
  0x5c   :  { %2993 = vmatmul.mubr.msk.f32.gmra.mrb[2].mxu0 %vm233_vm3, %v546_v28 }
  0x5d   :  { %3272 = vmatpush3.bf16.msra.mxu0 %v3269_v26  ;;  %3003 = vmatprep.mubr.msk.f32.mxu0 %vm233_vm3, %v660_v32 }
  0x60   :  { %3004 = vmatmul.mubr.msk.f32.vlgmr.msra.gmra.mrb[0].mxu0 %vm233_vm3, %v663_v33 }
  0x61   :  { %3006 = vmatprep.mubr.msk.f32.mxu0 %vm233_vm3, %v658_v37 }
  0x64   :  { %3007 = vmatmul.mubr.msk.f32.gmra.mrb[2].mxu0 %vm233_vm3, %v665_v38  ;;  %v3285_v38 = vpack.c.bf16 %v803_v16, %v802_v13  ;;  %v1409_v13 = vld [vmem:[#allocation4 + $0x170] sm:$0xff] }
 0x133   :  { %v3005_v49 = vpop.f32.mrb[0].mxu0 }
 0x134   :  { %v780_v50 = vadd.f32 %v3005_v49, %v2699_v48  ;;  %v749_v51 = vpop.f32.mrb[1].mxu0 }
 0x135   :  { %v779_v52 = vadd.f32 %v2699_v48, %v749_v51 }
 0x136   :  { %v3770_v53 = vmax.f32 %v780_v50, 0.0  ;;  %v3289_v50 = vpack.c.bf16 %v1017_v43, %v1016_v42 }
 0x137   :  { %v3772_v54 = vmax.f32 %v779_v52, 0.0  ;;  %v3008_v55 = vpop.f32.mrb[2].mxu0  ;;  %v1018_v52 = vld [vmem:[#allocation4 + $0xf0] sm:$0xff] }
 0x138   :  { %v782_v56 = vadd.f32 %v3008_v55, %v2699_v48  ;;  %v759_v57 = vpop.f32.mrb[3].mxu0  ;;  %v805_v58 = vrot.slane %v3770_v53, 7  ;;  %v788_v59 = vrot.slane %v3770_v53, 6  ;;  %v1122_v60 = vrot.slane %v3770_v53, 1  ;;  %v1019_v55 = vld [vmem:[#allocation4 + $0xf8] sm:$0xff] }
 0x139   :  { %v781_v61 = vadd.f32 %v2699_v48, %v759_v57  ;;  %v804_v62 = vrot.slane %v3772_v54, 7  ;;  %v787_v63 = vrot.slane %v3772_v54, 6  ;;  %v1121_v0 = vrot.slane %v3772_v54, 1 }
 0x13a   :  { %v3780_v2 = vmax.f32 %v782_v56, 0.0  ;;  %v1239_v3 = vrot.slane %v3772_v54, 2  ;;  %v1240_v4 = vrot.slane %v3770_v53, 2  ;;  %v3293_v56 = vpack.c.bf16 %v1019_v55, %v1018_v52 }
 0x13b   :  { %v3784_v5 = vmax.f32 %v781_v61, 0.0  ;;  %v810_v7 = vsel %vm219_vm1, %v804_v62, %v805_v58  ;;  %v793_v8 = vsel %vm202_vm5, %v787_v63, %v788_v59  ;;  %v3792_v9 = vsel %vm538_vm7, %v1121_v0, %v1122_v60  ;;  %v1137_v61 = vld [vmem:[#allocation4 + $0x118] sm:$0xff] }
 0x13c   :  { %v807_v12 = vrot.slane %v3780_v2, 7  ;;  %v790_v17 = vrot.slane %v3780_v2, 6  ;;  %v1124_v20 = vrot.slane %v3780_v2, 1  ;;  %v3799_v21 = vsel %vm657_vm10, %v1239_v3, %v1240_v4 }
 0x13d   :  { %v1123_v23 = vrot.slane %v3784_v5, 1  ;;  %v1241_v24 = vrot.slane %v3784_v5, 2  ;;  %v806_v26 = vrot.slane %v3784_v5, 7  ;;  %v789_v27 = vrot.slane %v3784_v5, 6 }
 0x13e   :  { %v811_v28 = vsel %vm219_vm1, %v807_v12, %v804_v62  ;;  %v794_v30 = vsel %vm202_vm5, %v790_v17, %v787_v63  ;;  %v3811_v31 = vsel %vm538_vm7, %v1124_v20, %v1121_v0  ;;  %v1242_v32 = vrot.slane %v3780_v2, 2  ;;  %v1252_v63 = vld [vmem:[#allocation4 + $0x120] sm:$0xff]  ;;  %v1253_v0 = vld [vmem:[#allocation4 + $0x128] sm:$0xff] }
 0x13f   :  { %v812_v33 = vmul.f32 %v3647_v15, %v811_v28  ;;  %v809_v35 = vsel %vm219_vm1, %v805_v58, %v806_v26  ;;  %v808_v37 = vsel %vm219_vm1, %v806_v26, %v807_v12  ;;  %v792_v40 = vsel %vm202_vm5, %v788_v59, %v789_v27  ;;  %v1134_v58 = vld [vmem:[#allocation4 + $0x100] sm:$0xff]  ;;  %v1135_v59 = vld [vmem:[#allocation4 + $0x108] sm:$0xff] }
 0x140   :  { %v814_v39 = vmul.f32 %v3665_v25, %v809_v35  ;;  %v791_v41 = vsel %vm202_vm5, %v789_v27, %v790_v17  ;;  %v1126_v14 = vsel %vm538_vm7, %v1122_v60, %v1123_v23  ;;  %v1125_v44 = vsel %vm538_vm7, %v1123_v23, %v1124_v20  ;;  %v1136_v60 = vld [vmem:[#allocation4 + $0x110] sm:$0xff]  ;;  %v1408_v12 = vld [vmem:[#allocation4 + $0x168] sm:$0xff]  ;;  %v1410_v17 = vld [vmem:[#allocation4 + $0x178] sm:$0xff] }
 0x141   :  { %3017 = vmatprep.mubr.msk.f32.mxu1 %vm233_vm3, %v812_v33  ;;  %v1244_v45 = vsel %vm657_vm10, %v1240_v4, %v1241_v24  ;;  %v1243_v48 = vsel %vm657_vm10, %v1241_v24, %v1242_v32  ;;  %v1246_v49 = vsel %vm657_vm10, %v1242_v32, %v1239_v3  ;;  %v795_v51 = vmul.f32 %v3681_v36, %v794_v30  ;;  %v1254_v4 = vld [vmem:[#allocation4 + $0x130] sm:$0xff]  ;;  %v1391_v23 = vld [vmem:[#allocation4 + $0x148] sm:$0xff]  ;;  %v2721_v26 = vld [vmem:[%s4090_s2 + $0x1] ss:$0 sm:$0xff] }
 0x142   :  { %3018 = vmatmul.mubr.msk.f32.vlgmr.msra.gmra.mrb[0].mxu1 %vm233_vm3, %v810_v7  ;;  %v797_v57 = vmul.f32 %v3693_v46, %v792_v40  ;;  %v3301_v62 = vpack.c.bf16 %v1137_v61, %v1136_v60  ;;  %v3305_v3 = vpack.c.bf16 %v1253_v0, %v1252_v63  ;;  %v1255_v7 = vld [vmem:[#allocation4 + $0x138] sm:$0xff]  ;;  %v3317_v20 = vpack.c.bf16 %v1410_v17, %v1409_v13 }
 0x143   :  { %3020 = vmatprep.mubr.msk.f32.mxu1 %vm233_vm3, %v814_v39  ;;  %3284 = vmatpush3.bf16.msra.mxu1 %v3281_v47  ;;  %v3297_v47 = vpack.c.bf16 %v1135_v59, %v1134_v58  ;;  %v1606_v59 = vld [vmem:[#allocation4 + $0x180] sm:$0xff]  ;;  %v1727_v17 = vld [vmem:[#allocation4 + $0x1b8] sm:$0xff] }
 0x144   :  { %3286 = vmatprep.subr.bf16.mxu1 %v3285_v38 }
 0x146   :  { %3021 = vmatmul.mubr.msk.f32.gmra.mrb[2].mxu1 %vm233_vm3, %v808_v37 }
 0x147   :  { %3288 = vmatpush3.bf16.msra.mxu1 %v3285_v38  ;;  %3031 = vmatprep.mubr.msk.f32.mxu1 %vm233_vm3, %v795_v51  ;;  %v1393_v51 = vld [vmem:[#allocation4 + $0x158] sm:$0xff] }
 0x148   :  { %3290 = vmatprep.subr.bf16.mxu1 %v3289_v50 }
 0x14a   :  { %3032 = vmatmul.mubr.msk.f32.vlgmr.msra.gmra.mrb[0].mxu1 %vm233_vm3, %v793_v8  ;;  %v3309_v8 = vpack.c.bf16 %v1255_v7, %v1254_v4  ;;  %v1608_v4 = vld [vmem:[#allocation4 + $0x190] sm:$0xff]  ;;  %v1609_v7 = vld [vmem:[#allocation4 + $0x198] sm:$0xff] }
 0x14b   :  { %3034 = vmatprep.mubr.msk.f32.mxu1 %vm233_vm3, %v797_v57  ;;  %3292 = vmatpush3.bf16.msra.mxu1 %v3289_v50  ;;  %v1392_v50 = vld [vmem:[#allocation4 + $0x150] sm:$0xff] }
 0x14c   :  { %3294 = vmatprep.subr.bf16.mxu1 %v3293_v56 }
 0x14e   :  { %3035 = vmatmul.mubr.msk.f32.gmra.mrb[2].mxu1 %vm233_vm3, %v791_v41 }
 0x14f   :  { %3296 = vmatpush3.bf16.msra.mxu1 %v3293_v56  ;;  %3045 = vmatprep.mubr.msk.f32.mxu1 %vm233_vm3, %v3772_v54  ;;  %v1130_v54 = vmul.f32 %v3720_v6, %v1126_v14  ;;  %v3325_v56 = vpack.c.bf16 %v1393_v51, %v1392_v50 }
 0x150   :  { %3298 = vmatprep.subr.bf16.mxu1 %v3297_v47 }
 0x152   :  { %3046 = vmatmul.mubr.msk.f32.vlgmr.msra.gmra.mrb[0].mxu1 %vm233_vm3, %v3770_v53  ;;  %v1132_v53 = vmul.f32 %v3733_v19, %v3811_v31 }
 0x153   :  { %3048 = vmatprep.mubr.msk.f32.mxu1 %vm233_vm3, %v3784_v5  ;;  %3300 = vmatpush3.bf16.msra.mxu1 %v3297_v47  ;;  %v1250_v5 = vmul.f32 %v3757_v34, %v1246_v49  ;;  %v1607_v47 = vld [vmem:[#allocation4 + $0x188] sm:$0xff] }
 0x154   :  { %3302 = vmatprep.subr.bf16.mxu1 %v3301_v62  ;;  %v3329_v63 = vpack.c.bf16 %v1607_v47, %v1606_v59  ;;  %v1996_v59 = vld [vmem:[#allocation4 + $0x218] sm:$0xff] }
 0x156   :  { %3049 = vmatmul.mubr.msk.f32.gmra.mrb[2].mxu1 %vm233_vm3, %v3780_v2  ;;  %v1248_v2 = vmul.f32 %v3746_v29, %v1244_v45 }
 0x157   :  { %3304 = vmatpush3.bf16.msra.mxu1 %v3301_v62  ;;  %3059 = vmatprep.mubr.msk.f32.mxu1 %vm233_vm3, %v3792_v9  ;;  %v1407_v9 = vld [vmem:[#allocation4 + $0x160] sm:$0xff] }
 0x158   :  { %3306 = vmatprep.subr.bf16.mxu1 %v3305_v3  ;;  %v3313_v16 = vpack.c.bf16 %v1408_v12, %v1407_v9  ;;  %v1725_v9 = vld [vmem:[#allocation4 + $0x1a8] sm:$0xff] }
 0x15a   :  { %3060 = vmatmul.mubr.msk.f32.vlgmr.msra.gmra.mrb[0].mxu1 %vm233_vm3, %v1130_v54  ;;  %3314 = vmatprep.subr.bf16.mxu0 %v3313_v16 }
 0x15b   :  { %3062 = vmatprep.mubr.msk.f32.mxu1 %vm233_vm3, %v1125_v44  ;;  %3308 = vmatpush3.bf16.msra.mxu1 %v3305_v3 }
 0x15c   :  { %3310 = vmatprep.subr.bf16.mxu1 %v3309_v8  ;;  %3316 = vmatpush3.bf16.msra.mxu0 %v3313_v16  ;;  %v1726_v16 = vld [vmem:[#allocation4 + $0x1b0] sm:$0xff] }
 0x15d   :  { %3318 = vmatprep.subr.bf16.mxu0 %v3317_v20 }
 0x15e   :  { %3063 = vmatmul.mubr.msk.f32.gmra.mrb[2].mxu1 %vm233_vm3, %v1132_v53 }
 0x15f   :  { %3312 = vmatpush3.bf16.msra.mxu1 %v3309_v8  ;;  %3073 = vmatprep.mubr.msk.f32.mxu1 %vm233_vm3, %v3799_v21  ;;  %v1390_v21 = vld [vmem:[#allocation4 + $0x140] sm:$0xff]  ;;  %v3333_v8 = vpack.c.bf16 %v1609_v7, %v1608_v4 }
 0x160   :  { %3320 = vmatpush3.bf16.msra.mxu0 %v3317_v20  ;;  %v3321_v24 = vpack.c.bf16 %v1391_v23, %v1390_v21  ;;  %v3341_v20 = vpack.c.bf16 %v1727_v17, %v1726_v16  ;;  %v1842_v23 = vld [vmem:[#allocation4 + $0x1c0] sm:$0xff] }
 0x162   :  { %3074 = vmatmul.mubr.msk.f32.vlgmr.msra.gmra.mrb[0].mxu1 %vm233_vm3, %v1248_v2  ;;  %3322 = vmatprep.subr.bf16.mxu0 %v3321_v24 }
 0x163   :  { %3076 = vmatprep.mubr.msk.f32.mxu1 %vm233_vm3, %v1243_v48 }
 0x166   :  { %3077 = vmatmul.mubr.msk.f32.gmra.mrb[2].mxu1 %vm233_vm3, %v1250_v5  ;;  %v1724_v5 = vld [vmem:[#allocation4 + $0x1a0] sm:$0xff] }
 0x167   :  { %v3337_v12 = vpack.c.bf16 %v1725_v9, %v1724_v5 }
 0x235   :  { %v3075_v27 = vpop.f32.mrb[0].mxu1 }
 0x236   :  { %v1366_v28 = vadd.f32 %v3075_v27, %v2721_v26  ;;  %v1334_v30 = vpop.f32.mrb[1].mxu1 }
 0x237   :  { %v1365_v31 = vadd.f32 %v2721_v26, %v1334_v30 }
 0x238   :  { %v1370_v32 = vmax.f32 %v1366_v28, 0.0 }
 0x239   :  { %v1369_v33 = vmax.f32 %v1365_v31, 0.0  ;;  %v3078_v35 = vpop.f32.mrb[2].mxu1 }
 0x23a   :  { %v1368_v37 = vadd.f32 %v3078_v35, %v2721_v26  ;;  %v1344_v38 = vpop.f32.mrb[3].mxu1  ;;  %v3874_v14 = vadd.f32 %v1370_v32, %v3651_v18  ;;  %v1844_v32 = vld [vmem:[#allocation4 + $0x1d0] sm:$0xff] }
 0x23b   :  { %v1367_v39 = vadd.f32 %v2721_v26, %v1344_v38  ;;  %v3871_v40 = vadd.f32 %v1369_v33, %v3637_v10  ;;  %v1845_v33 = vld [vmem:[#allocation4 + $0x1d8] sm:$0xff] }
 0x23c   :  { %v1372_v41 = vmax.f32 %v1368_v37, 0.0  ;;  %v1395_v49 = vrot.slane %v3874_v14, 7  ;;  %v1378_v62 = vrot.slane %v3874_v14, 6  ;;  %v1712_v27 = vrot.slane %v3874_v14, 1 }
 0x23d   :  { %v1371_v42 = vmax.f32 %v1367_v39, 0.0  ;;  %v1394_v45 = vrot.slane %v3871_v40, 7  ;;  %v1377_v57 = vrot.slane %v3871_v40, 6  ;;  %v1711_v26 = vrot.slane %v3871_v40, 1 }
 0x23e   :  { %v3877_v43 = vadd.f32 %v1372_v41, %v3639_v11  ;;  %v3349_v38 = vpack.c.bf16 %v1845_v33, %v1844_v32  ;;  %v1978_v33 = vld [vmem:[#allocation4 + $0x1f0] sm:$0xff] }
 0x23f   :  { %v3880_v44 = vadd.f32 %v1371_v42, %v3654_v22  ;;  %v1400_v58 = vsel %vm219_vm1, %v1394_v45, %v1395_v49  ;;  %v1383_v53 = vsel %vm202_vm5, %v1377_v57, %v1378_v62  ;;  %v1717_v35 = vsel %vm538_vm7, %v1711_v26, %v1712_v27 }
 0x240   :  { %v1397_v48 = vrot.slane %v3877_v43, 7  ;;  %v1380_v52 = vrot.slane %v3877_v43, 6  ;;  %v1714_v31 = vrot.slane %v3877_v43, 1  ;;  %v1832_v50 = vrot.slane %v3877_v43, 2 }
 0x241   :  { %v1396_v10 = vrot.slane %v3880_v44, 7  ;;  %v1379_v61 = vrot.slane %v3880_v44, 6  ;;  %v1713_v21 = vrot.slane %v3880_v44, 1  ;;  %v1831_v41 = vrot.slane %v3880_v44, 2 }
 0x242   :  { %v1401_v18 = vsel %vm219_vm1, %v1397_v48, %v1394_v45  ;;  %v1384_v60 = vsel %vm202_vm5, %v1380_v52, %v1377_v57  ;;  %v1718_v39 = vsel %vm538_vm7, %v1714_v31, %v1711_v26  ;;  %v1829_v45 = vrot.slane %v3871_v40, 2 }
 0x243   :  { %v1402_v11 = vmul.f32 %v3647_v15, %v1401_v18  ;;  %v1399_v22 = vsel %vm219_vm1, %v1395_v49, %v1396_v10  ;;  %v1398_v0 = vsel %vm219_vm1, %v1396_v10, %v1397_v48  ;;  %v1385_v3 = vmul.f32 %v3681_v36, %v1384_v60  ;;  %v1976_v60 = vld [vmem:[#allocation4 + $0x1e0] sm:$0xff] }
 0x244   :  { %v1404_v55 = vmul.f32 %v3665_v25, %v1399_v22  ;;  %v1382_v54 = vsel %vm202_vm5, %v1378_v62, %v1379_v61  ;;  %v1381_v13 = vsel %vm202_vm5, %v1379_v61, %v1380_v52  ;;  %v1716_v30 = vsel %vm538_vm7, %v1712_v27, %v1713_v21  ;;  %v1977_v61 = vld [vmem:[#allocation4 + $0x1e8] sm:$0xff] }
 0x245   :  { %3087 = vmatprep.mubr.msk.f32.mxu0 %vm233_vm3, %v1402_v11  ;;  %v1387_v2 = vmul.f32 %v3693_v46, %v1382_v54  ;;  %v1720_v37 = vmul.f32 %v3720_v6, %v1716_v30  ;;  %v1715_v42 = vsel %vm538_vm7, %v1713_v21, %v1714_v31  ;;  %v1830_v48 = vrot.slane %v3874_v14, 2 }
 0x246   :  { %3088 = vmatmul.mubr.msk.f32.vlgmr.msra.gmra.mrb[4].mxu0 %vm233_vm3, %v1400_v58  ;;  %v1722_v49 = vmul.f32 %v3733_v19, %v1718_v39  ;;  %v1836_v52 = vsel %vm657_vm10, %v1832_v50, %v1829_v45  ;;  %v1833_v11 = vsel %vm657_vm10, %v1831_v41, %v1832_v50  ;;  %v1995_v58 = vld [vmem:[#allocation4 + $0x210] sm:$0xff]  ;;  %v3361_v62 = vpack.c.bf16 %v1977_v61, %v1976_v60 }
 0x247   :  { %3090 = vmatprep.mubr.msk.f32.mxu0 %vm233_vm3, %v1404_v55  ;;  %3324 = vmatpush3.bf16.msra.mxu0 %v3321_v24  ;;  %v1843_v24 = vld [vmem:[#allocation4 + $0x1c8] sm:$0xff]  ;;  %v1834_v10 = vsel %vm657_vm10, %v1830_v48, %v1831_v41  ;;  %v1835_v51 = vsel %vm657_vm10, %v1829_v45, %v1830_v48  ;;  %v1840_v22 = vmul.f32 %v3757_v34, %v1836_v52  ;;  %v1993_v55 = vld [vmem:[#allocation4 + $0x200] sm:$0xff] }
 0x248   :  { %3326 = vmatprep.subr.bf16.mxu0 %v3325_v56  ;;  %v3345_v28 = vpack.c.bf16 %v1843_v24, %v1842_v23  ;;  %v1838_v18 = vmul.f32 %v3746_v29, %v1834_v10  ;;  %v3357_v47 = vpack.c.bf16 %v1996_v59, %v1995_v58  ;;  %v2193_v59 = vld [vmem:[#allocation4 + $0x228] sm:$0xff] }
 0x24a   :  { %3091 = vmatmul.mubr.msk.f32.gmra.mrb[6].mxu0 %vm233_vm3, %v1398_v0 }
 0x24b   :  { %3328 = vmatpush3.bf16.msra.mxu0 %v3325_v56  ;;  %3101 = vmatprep.mubr.msk.f32.mxu0 %vm233_vm3, %v1385_v3  ;;  %v1994_v56 = vld [vmem:[#allocation4 + $0x208] sm:$0xff] }
 0x24c   :  { %3330 = vmatprep.subr.bf16.mxu0 %v3329_v63  ;;  %v3353_v57 = vpack.c.bf16 %v1994_v56, %v1993_v55 }
 0x24e   :  { %3102 = vmatmul.mubr.msk.f32.vlgmr.msra.gmra.mrb[4].mxu0 %vm233_vm3, %v1383_v53  ;;  %3354 = vmatprep.subr.bf16.mxu1 %v3353_v57 }
 0x24f   :  { %3104 = vmatprep.mubr.msk.f32.mxu0 %vm233_vm3, %v1387_v2  ;;  %3332 = vmatpush3.bf16.msra.mxu0 %v3329_v63  ;;  %v2743_v63 = vld [vmem:[%s4090_s2 + $0x2] ss:$0 sm:$0xff] }
 0x250   :  { %3334 = vmatprep.subr.bf16.mxu0 %v3333_v8  ;;  %3356 = vmatpush3.bf16.msra.mxu1 %v3353_v57 }
 0x251   :  { %3358 = vmatprep.subr.bf16.mxu1 %v3357_v47 }
 0x252   :  { %3105 = vmatmul.mubr.msk.f32.gmra.mrb[6].mxu0 %vm233_vm3, %v1381_v13 }
 0x253   :  { %3336 = vmatpush3.bf16.msra.mxu0 %v3333_v8  ;;  %3115 = vmatprep.mubr.msk.f32.mxu0 %vm233_vm3, %v3871_v40 }
 0x254   :  { %3338 = vmatprep.subr.bf16.mxu0 %v3337_v12  ;;  %3360 = vmatpush3.bf16.msra.mxu1 %v3357_v47 }
 0x255   :  { %3362 = vmatprep.subr.bf16.mxu1 %v3361_v62 }
 0x256   :  { %3116 = vmatmul.mubr.msk.f32.vlgmr.msra.gmra.mrb[4].mxu0 %vm233_vm3, %v3874_v14 }
 0x257   :  { %3118 = vmatprep.mubr.msk.f32.mxu0 %vm233_vm3, %v3880_v44  ;;  %3340 = vmatpush3.bf16.msra.mxu0 %v3337_v12 }
 0x258   :  { %3342 = vmatprep.subr.bf16.mxu0 %v3341_v20 }
 0x25a   :  { %3119 = vmatmul.mubr.msk.f32.gmra.mrb[6].mxu0 %vm233_vm3, %v3877_v43 }
 0x25b   :  { %3344 = vmatpush3.bf16.msra.mxu0 %v3341_v20  ;;  %3129 = vmatprep.mubr.msk.f32.mxu0 %vm233_vm3, %v1717_v35  ;;  %v1979_v35 = vld [vmem:[#allocation4 + $0x1f8] sm:$0xff] }
 0x25c   :  { %3346 = vmatprep.subr.bf16.mxu0 %v3345_v28 }
 0x25e   :  { %3130 = vmatmul.mubr.msk.f32.vlgmr.msra.gmra.mrb[4].mxu0 %vm233_vm3, %v1720_v37 }
 0x25f   :  { %3132 = vmatprep.mubr.msk.f32.mxu0 %vm233_vm3, %v1715_v42  ;;  %3348 = vmatpush3.bf16.msra.mxu0 %v3345_v28 }
 0x260   :  { %3350 = vmatprep.subr.bf16.mxu0 %v3349_v38 }
 0x262   :  { %3133 = vmatmul.mubr.msk.f32.gmra.mrb[6].mxu0 %vm233_vm3, %v1722_v49 }
 0x263   :  { %3352 = vmatpush3.bf16.msra.mxu0 %v3349_v38  ;;  %3143 = vmatprep.mubr.msk.f32.mxu0 %vm233_vm3, %v1835_v51 }
 0x266   :  { %3144 = vmatmul.mubr.msk.f32.vlgmr.msra.gmra.mrb[4].mxu0 %vm233_vm3, %v1838_v18 }
 0x267   :  { %3146 = vmatprep.mubr.msk.f32.mxu0 %vm233_vm3, %v1833_v11 }
 0x26a   :  { %3147 = vmatmul.mubr.msk.f32.gmra.mrb[6].mxu0 %vm233_vm3, %v1840_v22  ;;  %v3365_v22 = vpack.c.bf16 %v1979_v35, %v1978_v33 }
 0x339   :  { %v3145_v0 = vpop.f32.mrb[4].mxu0 }
 0x33a   :  { %v1956_v3 = vadd.f32 %v3145_v0, %v2743_v63  ;;  %v1924_v4 = vpop.f32.mrb[5].mxu0 }
 0x33b   :  { %v1955_v7 = vadd.f32 %v2743_v63, %v1924_v4  ;;  %v2195_v4 = vld [vmem:[#allocation4 + $0x238] sm:$0xff] }
 0x33c   :  { %v3965_v54 = vmax.f32 %v1956_v3, 0.0  ;;  %v2194_v3 = vld [vmem:[#allocation4 + $0x230] sm:$0xff] }
 0x33d   :  { %v3967_v8 = vmax.f32 %v1955_v7, 0.0  ;;  %v3148_v53 = vpop.f32.mrb[6].mxu0  ;;  %v3373_v7 = vpack.c.bf16 %v2195_v4, %v2194_v3 }
 0x33e   :  { %v1958_v2 = vadd.f32 %v3148_v53, %v2743_v63  ;;  %v1934_v5 = vpop.f32.mrb[7].mxu0  ;;  %v1981_v9 = vrot.slane %v3965_v54, 7  ;;  %v1964_v12 = vrot.slane %v3965_v54, 6  ;;  %v2298_v13 = vrot.slane %v3965_v54, 1 }
 0x33f   :  { %v1957_v16 = vadd.f32 %v2743_v63, %v1934_v5  ;;  %v1980_v17 = vrot.slane %v3967_v8, 7  ;;  %v1963_v20 = vrot.slane %v3967_v8, 6  ;;  %v2297_v21 = vrot.slane %v3967_v8, 1  ;;  %v2313_v5 = vld [vmem:[#allocation4 + $0x258] sm:$0xff] }
 0x340   :  { %v3975_v23 = vmax.f32 %v1958_v2, 0.0  ;;  %v2415_v24 = vrot.slane %v3967_v8, 2  ;;  %v2416_v26 = vrot.slane %v3965_v54, 2  ;;  %v2311_v2 = vld [vmem:[#allocation4 + $0x248] sm:$0xff] }
 0x341   :  { %v3979_v27 = vmax.f32 %v1957_v16, 0.0  ;;  %v1986_v28 = vsel %vm219_vm1, %v1980_v17, %v1981_v9  ;;  %v1969_v30 = vsel %vm202_vm5, %v1963_v20, %v1964_v12  ;;  %v3987_v31 = vsel %vm538_vm7, %v2297_v21, %v2298_v13  ;;  %v2430_v16 = vld [vmem:[#allocation4 + $0x270] sm:$0xff] }
 0x342   :  { %v1983_v32 = vrot.slane %v3975_v23, 7  ;;  %v1966_v37 = vrot.slane %v3975_v23, 6  ;;  %v2300_v38 = vrot.slane %v3975_v23, 1  ;;  %v3994_v39 = vsel %vm657_vm10, %v2415_v24, %v2416_v26 }
 0x343   :  { %v2299_v41 = vrot.slane %v3979_v27, 1  ;;  %v2417_v42 = vrot.slane %v3979_v27, 2  ;;  %v1982_v45 = vrot.slane %v3979_v27, 7  ;;  %v1965_v48 = vrot.slane %v3979_v27, 6 }
 0x344   :  { %v1987_v49 = vsel %vm219_vm1, %v1983_v32, %v1980_v17  ;;  %v1970_v10 = vsel %vm202_vm5, %v1966_v37, %v1963_v20  ;;  %v4006_v50 = vsel %vm538_vm7, %v2300_v38, %v2297_v21  ;;  %v2418_v51 = vrot.slane %v3975_v23, 2  ;;  %v2431_v17 = vld [vmem:[#allocation4 + $0x278] sm:$0xff] }
 0x345   :  { %v1988_v18 = vmul.f32 %v3647_v15, %v1987_v49  ;;  %v1985_v52 = vsel %vm219_vm1, %v1981_v9, %v1982_v45  ;;  %v1984_v11 = vsel %vm219_vm1, %v1982_v45, %v1983_v32  ;;  %v1968_v56 = vsel %vm202_vm5, %v1964_v12, %v1965_v48  ;;  %v2192_v15 = vld [vmem:[#allocation4 + $0x220] sm:$0xff]  ;;  %v2429_v12 = vld [vmem:[#allocation4 + $0x268] sm:$0xff] }
 0x346   :  { %v1990_v55 = vmul.f32 %v3665_v25, %v1985_v52  ;;  %v1967_v57 = vsel %vm202_vm5, %v1965_v48, %v1966_v37  ;;  %v2302_v58 = vsel %vm538_vm7, %v2298_v13, %v2299_v41  ;;  %v2301_v47 = vsel %vm538_vm7, %v2299_v41, %v2300_v38 }
 0x347   :  { %3157 = vmatprep.mubr.msk.f32.mxu1 %vm233_vm3, %v1988_v18  ;;  %v2420_v25 = vsel %vm657_vm10, %v2416_v26, %v2417_v42  ;;  %v2419_v60 = vsel %vm657_vm10, %v2417_v42, %v2418_v51  ;;  %v2422_v61 = vsel %vm657_vm10, %v2418_v51, %v2415_v24  ;;  %v3369_v63 = vpack.c.bf16 %v2193_v59, %v2192_v15  ;;  %v2554_v24 = vld [vmem:[#allocation6 + $0x8] sm:$0xff]  ;;  %v2555_v26 = vld [vmem:[#allocation6 + $0x10] sm:$0xff] }
 0x348   :  { %3158 = vmatmul.mubr.msk.f32.vlgmr.msra.gmra.mrb[4].mxu1 %vm233_vm3, %v1986_v28  ;;  %v1971_v0 = vmul.f32 %v3681_v36, %v1970_v10  ;;  %v1973_v53 = vmul.f32 %v3693_v46, %v1968_v56  ;;  %v3377_v36 = vpack.c.bf16 %v2311_v2, %v2310_v1  ;;  %v2428_v46 = vld [vmem:[#allocation4 + $0x260] sm:$0xff]  ;;  %v3389_v20 = vpack.c.bf16 %v2431_v17, %v2430_v16 }
 0x349   :  { %3160 = vmatprep.mubr.msk.f32.mxu1 %vm233_vm3, %v1990_v55  ;;  %3364 = vmatpush3.bf16.msra.mxu1 %v3361_v62  ;;  %v2312_v62 = vld [vmem:[#allocation4 + $0x250] sm:$0xff]  ;;  %v3385_v13 = vpack.c.bf16 %v2429_v12, %v2428_v46  ;;  %v2424_v21 = vmul.f32 %v3746_v29, %v2420_v25  ;;  %v2765_v29 = vld [vmem:[%s4090_s2 + $0x3] ss:$0 sm:$0xff] }
 0x34a   :  { %3366 = vmatprep.subr.bf16.mxu1 %v3365_v22  ;;  %v3381_v9 = vpack.c.bf16 %v2313_v5, %v2312_v62 }
 0x34c   :  { %3161 = vmatmul.mubr.msk.f32.gmra.mrb[6].mxu1 %vm233_vm3, %v1984_v11 }
 0x34d   :  { %3368 = vmatpush3.bf16.msra.mxu1 %v3365_v22  ;;  %3171 = vmatprep.mubr.msk.f32.mxu1 %vm233_vm3, %v1971_v0 }
 0x34e   :  { %3370 = vmatprep.subr.bf16.mxu1 %v3369_v63 }
 0x350   :  { %3172 = vmatmul.mubr.msk.f32.vlgmr.msra.gmra.mrb[4].mxu1 %vm233_vm3, %v1969_v30 }
 0x351   :  { %3174 = vmatprep.mubr.msk.f32.mxu1 %vm233_vm3, %v1973_v53  ;;  %3372 = vmatpush3.bf16.msra.mxu1 %v3369_v63 }
 0x352   :  { %3374 = vmatprep.subr.bf16.mxu1 %v3373_v7 }
 0x354   :  { %3175 = vmatmul.mubr.msk.f32.gmra.mrb[6].mxu1 %vm233_vm3, %v1967_v57 }
 0x355   :  { %3376 = vmatpush3.bf16.msra.mxu1 %v3373_v7  ;;  %3185 = vmatprep.mubr.msk.f32.mxu1 %vm233_vm3, %v3967_v8  ;;  %v2306_v8 = vmul.f32 %v3720_v6, %v2302_v58  ;;  %v2426_v6 = vmul.f32 %v3757_v34, %v2422_v61 }
 0x356   :  { %3378 = vmatprep.subr.bf16.mxu1 %v3377_v36 }
 0x358   :  { %3186 = vmatmul.mubr.msk.f32.vlgmr.msra.gmra.mrb[4].mxu1 %vm233_vm3, %v3965_v54  ;;  %v2308_v54 = vmul.f32 %v3733_v19, %v4006_v50 }
 0x359   :  { %3188 = vmatprep.mubr.msk.f32.mxu1 %vm233_vm3, %v3979_v27  ;;  %3380 = vmatpush3.bf16.msra.mxu1 %v3377_v36  ;;  %v2556_v27 = vld [vmem:[#allocation6 + $0x18] sm:$0xff] }
 0x35a   :  { %3382 = vmatprep.subr.bf16.mxu1 %v3381_v9  ;;  %v3397_v28 = vpack.c.bf16 %v2556_v27, %v2555_v26 }
 0x35c   :  { %3189 = vmatmul.mubr.msk.f32.gmra.mrb[6].mxu1 %vm233_vm3, %v3975_v23  ;;  %v2553_v23 = vld [vmem:[#allocation6] sm:$0xff] }
 0x35d   :  { %3384 = vmatpush3.bf16.msra.mxu1 %v3381_v9  ;;  %3199 = vmatprep.mubr.msk.f32.mxu1 %vm233_vm3, %v3987_v31  ;;  %v3393_v19 = vpack.c.bf16 %v2554_v24, %v2553_v23 }
 0x35e   :  { %3386 = vmatprep.subr.bf16.mxu1 %v3385_v13 }
 0x35f   :  { %3394 = vmatprep.subr.bf16.mxu0 %v3393_v19 }
 0x360   :  { %3200 = vmatmul.mubr.msk.f32.vlgmr.msra.gmra.mrb[4].mxu1 %vm233_vm3, %v2306_v8  ;;  %3396 = vmatpush3.bf16.msra.mxu0 %v3393_v19 }
 0x361   :  { %3202 = vmatprep.mubr.msk.f32.mxu1 %vm233_vm3, %v2301_v47  ;;  %3388 = vmatpush3.bf16.msra.mxu1 %v3385_v13 }
 0x362   :  { %3390 = vmatprep.subr.bf16.mxu1 %v3389_v20  ;;  %3398 = vmatprep.subr.bf16.mxu0 %v3397_v28 }
 0x364   :  { %3203 = vmatmul.mubr.msk.f32.gmra.mrb[6].mxu1 %vm233_vm3, %v2308_v54  ;;  %3400 = vmatpush3.bf16.msra.mxu0 %v3397_v28 }
 0x365   :  { %3392 = vmatpush3.bf16.msra.mxu1 %v3389_v20  ;;  %3213 = vmatprep.mubr.msk.f32.mxu1 %vm233_vm3, %v3994_v39 }
 0x366   :  { %3401 = vmatprep.subr.bf16.mxu1 %v3393_v19 }
 0x368   :  { %3214 = vmatmul.mubr.msk.f32.vlgmr.msra.gmra.mrb[4].mxu1 %vm233_vm3, %v2424_v21 }
 0x369   :  { %3216 = vmatprep.mubr.msk.f32.mxu1 %vm233_vm3, %v2419_v60  ;;  %3403 = vmatpush3.bf16.msra.mxu1 %v3393_v19 }
 0x36a   :  { %3402 = vmatprep.subr.bf16.mxu1 %v3397_v28 }
 0x36c   :  { %3217 = vmatmul.mubr.msk.f32.gmra.mrb[6].mxu1 %vm233_vm3, %v2426_v6 }
 0x36d   :  { %3404 = vmatpush3.bf16.msra.mxu1 %v3397_v28 }
 0x43b   :  { %v3215_v34 = vpop.f32.mrb[4].mxu1 }
 0x43c   :  { %v2542_v30 = vadd.f32 %v3215_v34, %v2765_v29  ;;  %v2510_v31 = vpop.f32.mrb[5].mxu1 }
 0x43d   :  { %v2541_v32 = vadd.f32 %v2765_v29, %v2510_v31 }
 0x43e   :  { %v2546_v33 = vmax.f32 %v2542_v30, 0.0 }
 0x43f   :  { %v2545_v35 = vmax.f32 %v2541_v32, 0.0  ;;  %v3218_v37 = vpop.f32.mrb[6].mxu1 }
 0x440   :  { %v2544_v38 = vadd.f32 %v3218_v37, %v2765_v29  ;;  %v2520_v39 = vpop.f32.mrb[7].mxu1  ;;  %v2550_v45 = vadd.f32 %v2546_v33, %v3874_v14 }
 0x441   :  { %v2549_v41 = vadd.f32 %v2545_v35, %v3871_v40  ;;  %v2543_v42 = vadd.f32 %v2765_v29, %v2520_v39  ;;  %v2766_v40 = vld [vmem:[%s4092_s4] ss:$0 sm:$0xff] }
 0x442   :  { %v2548_v48 = vmax.f32 %v2544_v38, 0.0 }
 0x443   :  { %v2547_v49 = vmax.f32 %v2543_v42, 0.0  ;;  %3227 = vmatprep.mubr.msk.f32.mxu0 %vm233_vm3, %v2549_v41 }
 0x444   :  { %3228 = vmatmul.mubr.msk.f32.vlgmr.msra.gmra.mrb[8].mxu0 %vm233_vm3, %v2550_v45  ;;  %v2552_v50 = vadd.f32 %v2548_v48, %v3877_v43 }
 0x445   :  { %v2551_v10 = vadd.f32 %v2547_v49, %v3880_v44 }
 0x447   :  { %3230 = vmatprep.mubr.msk.f32.mxu1 %vm233_vm3, %v2551_v10 }
 0x448   :  { %3231 = vmatmul.mubr.msk.f32.vlgmr.msra.gmra.mrb[8].mxu1 %vm233_vm3, %v2552_v50 }
 0x517   :  { %v3229_v51 = vpop.f32.mrb[8].mxu0 }
 0x518   :  { %v2648_v14 = vadd.f32 %v3229_v51, %v2766_v40  ;;  %v2642_v18 = vpop.f32.mrb[9].mxu0 }
 0x519   :  { %v2643_v52 = vadd.f32 %v2766_v40, %v2642_v18 }
 0x51a   :  { %2662 = vst [vmem:[%s4093_s5 + $0x8] sm:$0xff] %v2648_v14 }
 0x51b   :  { %2661 = vst [vmem:[%s4093_s5] sm:$0xff] %v2643_v52  ;;  %v3232_v43 = vpop.f32.mrb[8].mxu1 }
 0x51c   :  { %v2658_v44 = vadd.f32 %v3232_v43, %v2766_v40  ;;  %v2652_v11 = vpop.f32.mrb[9].mxu1 }
 0x51d   :  { %v2653_v22 = vadd.f32 %v2766_v40, %v2652_v11 }
 0x51e   :  { %2664 = vst [vmem:[%s4093_s5 + $0x18] sm:$0xff] %v2658_v44 }
 0x51f   :  { %2663 = vst [vmem:[%s4093_s5 + $0x10] sm:$0xff] %v2653_v22 }
 0x520   :  { %2669 = vsyncpa [#allocation3], 1 }
 0x521   :  { %2670 = vsyncpa [#allocation5], 1 }

</bundles_post_ra>
